<compile_context>
chip_gen: v7x
topology: tpu7x:2x2x1
jax: 0.10.0
libtpu: 0.0.40
codegen_flags: <defaults>
</compile_context>

<pallas_src>
import jax
import jax.numpy as jnp
from jax.experimental import pallas as pl

D_MODEL = 32
N_HEADS = 4
D_HEAD = D_MODEL // N_HEADS
D_FF = 64
SEQ_LEN = 8
BATCH = 2
NUM_LAYERS = 2
EPS = 1e-5


def _layer_norm(x, gamma, beta):
    # LayerNorm over last dim (nn.LayerNorm(d_model), eps=1e-5), one-pass stats:
    # a single full-width pass + one fewer XLU lane reduction than the two-pass form.
    mu = jnp.mean(x, axis=-1, keepdims=True)
    var = jnp.mean(x * x, axis=-1, keepdims=True) - mu * mu
    return (x - mu) * jax.lax.rsqrt(var + EPS) * gamma + beta


def fused_encoder_kernel(x_ref, group_ref, expand_ref,
                         wqkv_ref, bqkv_ref, wo_ref, bo_ref,
                         w1_ref, b1_ref, w2_ref, b2_ref, ln_ref, out_ref):
    x = x_ref[...]                                   # (B*L, D) f32
    group = group_ref[...]                           # (D, H): lane d -> its head
    expand = expand_ref[...]                         # (H, D): head h -> its lanes

    for l in range(NUM_LAYERS):                      # static unroll (NUM_LAYERS is small)
        # ---- multi-head self-attention, all heads at once -------------------
        # fused QKV projection (scale already folded into the Q columns of W)
        qkv = jnp.dot(x, wqkv_ref[l], preferred_element_type=jnp.float32) + bqkv_ref[l]
        qkv3 = qkv.reshape(BATCH, SEQ_LEN, 3 * D_MODEL)        # row-split only
        q = qkv3[:, :, 0:D_MODEL]                              # (B, L, D)
        k = qkv3[:, :, D_MODEL:2 * D_MODEL]                    # (B, L, D)
        v = qkv3[:, :, 2 * D_MODEL:3 * D_MODEL]                # (B, L, D)

        # per-head scores for all heads: s[b,qi,ki,h] = sum_{d in head h} q*k
        prod = q[:, :, None, :] * k[:, None, :, :]             # (B, Lq, Lk, D)
        s = jnp.dot(prod.reshape(BATCH * SEQ_LEN * SEQ_LEN, D_MODEL), group,
                    preferred_element_type=jnp.float32)
        s = s.reshape(BATCH, SEQ_LEN, SEQ_LEN, N_HEADS)        # (B, Lq, Lk, H)

        # softmax over keys (axis 2 = sublane axis), exact division for parity
        s = s - jnp.max(s, axis=2, keepdims=True)
        p = jnp.exp(s)
        p = p / jnp.sum(p, axis=2, keepdims=True)              # (B, Lq, Lk, H)

        # context: broadcast each head's prob onto its lanes, weight v, sum over keys
        p_lanes = jnp.dot(p.reshape(BATCH * SEQ_LEN * SEQ_LEN, N_HEADS), expand,
                          preferred_element_type=jnp.float32)
        p_lanes = p_lanes.reshape(BATCH, SEQ_LEN, SEQ_LEN, D_MODEL)
        ctx = jnp.sum(p_lanes * v[:, None, :, :], axis=2)      # (B, Lq, D)
        attn = ctx.reshape(BATCH * SEQ_LEN, D_MODEL)

        attn = jnp.dot(attn, wo_ref[l], preferred_element_type=jnp.float32) + bo_ref[l]

        ln = ln_ref[l]                                # (4, D): gamma1, beta1, gamma2, beta2
        y = _layer_norm(x + attn, ln[0:1, :], ln[1:2, :])

        # ---- position-wise FFN ----------------------------------------------
        h1 = jnp.dot(y, w1_ref[l], preferred_element_type=jnp.float32) + b1_ref[l]
        h1 = jnp.maximum(h1, 0.0)                     # ReLU
        ff = jnp.dot(h1, w2_ref[l], preferred_element_type=jnp.float32) + b2_ref[l]

        x = _layer_norm(y + ff, ln[2:3, :], ln[3:4, :])

    out_ref[...] = x


def encoder_forward(x, stacked_params):
    """Full Encoder.forward in a single Pallas kernel launch. x: (B, L, D) f32."""
    B, L, D = x.shape
    x2 = x.reshape(B * L, D)                          # free, wrapper-side

    # Constant head-grouping matrices (tiny): group[d, h] = 1 iff lane d is in head h.
    lane_head = jnp.arange(D_MODEL, dtype=jnp.int32) // D_HEAD
    group = (lane_head[:, None] == jnp.arange(N_HEADS, dtype=jnp.int32)[None, :]
             ).astype(jnp.float32)                    # (D, H)
    expand = (jnp.arange(N_HEADS, dtype=jnp.int32)[:, None] == lane_head[None, :]
              ).astype(jnp.float32)                   # (H, D)

    out = pl.pallas_call(
        fused_encoder_kernel,
        out_shape=jax.ShapeDtypeStruct((B * L, D), jnp.float32),
        # no grid: single invocation, all (tiny) operands resident in VMEM
    )(x2, group, expand, *stacked_params)
    return out.reshape(B, L, D)


def init_layer_params(key):
    """Deterministic parameter init for one encoder layer."""
    ks = jax.random.split(key, 6)
    sc = 0.05
    wq = sc * jax.random.normal(ks[0], (D_MODEL, D_MODEL), jnp.float32)
    wk = sc * jax.random.normal(ks[1], (D_MODEL, D_MODEL), jnp.float32)
    wv = sc * jax.random.normal(ks[2], (D_MODEL, D_MODEL), jnp.float32)
    w_qkv = jnp.concatenate([wq, wk, wv], axis=-1)            # (D, 3D)
    b_qkv = jnp.zeros((1, 3 * D_MODEL), jnp.float32)
    wo = sc * jax.random.normal(ks[3], (D_MODEL, D_MODEL), jnp.float32)
    bo = jnp.zeros((1, D_MODEL), jnp.float32)
    w1 = sc * jax.random.normal(ks[4], (D_MODEL, D_FF), jnp.float32)
    b1 = jnp.zeros((1, D_FF), jnp.float32)
    w2 = sc * jax.random.normal(ks[5], (D_FF, D_MODEL), jnp.float32)
    b2 = jnp.zeros((1, D_MODEL), jnp.float32)
    ln = jnp.stack([jnp.ones((D_MODEL,), jnp.float32),        # gamma1
                    jnp.zeros((D_MODEL,), jnp.float32),       # beta1
                    jnp.ones((D_MODEL,), jnp.float32),        # gamma2
                    jnp.zeros((D_MODEL,), jnp.float32)])      # beta2 -> (4, D)
    return (w_qkv, b_qkv, wo, bo, w1, b1, w2, b2, ln)


def stack_layer_params(per_layer):
    # Stack each param across a leading layer axis -> one kernel operand each.
    stacked = [jnp.stack(ps, axis=0) for ps in zip(*per_layer)]
    # One-time constant fold: 1/sqrt(D_HEAD) attention scale goes into the Q
    # projection (weights + bias) so the kernel never multiplies scores by it.
    scale = 1.0 / (D_HEAD ** 0.5)
    w_qkv, b_qkv = stacked[0], stacked[1]
    stacked[0] = w_qkv.at[:, :, :D_MODEL].multiply(scale)
    stacked[1] = b_qkv.at[:, :, :D_MODEL].multiply(scale)
    return tuple(stacked)


if __name__ == "__main__":
    key = jax.random.PRNGKey(0)
    k_x, *k_layers = jax.random.split(key, NUM_LAYERS + 1)

    x = jax.random.normal(k_x, (BATCH, SEQ_LEN, D_MODEL), jnp.float32)
    stacked_params = stack_layer_params([init_layer_params(k) for k in k_layers])

    out = encoder_forward(x, stacked_params)
    out = jax.block_until_ready(out)

    assert out.shape == (BATCH, SEQ_LEN, D_MODEL)
    assert bool(jnp.all(jnp.isfinite(out)))
    print("KERNEL_OK")
</pallas_src>

<mosaic_0001>
module attributes {stable_mosaic.version = 11 : i64} {
  func.func @fused_encoder_kernel(%arg0: memref<16x32xf32, #tpu.memory_space<vmem>>, %arg1: memref<32x4xf32, #tpu.memory_space<vmem>>, %arg2: memref<4x32xf32, #tpu.memory_space<vmem>>, %arg3: memref<2x32x96xf32, #tpu.memory_space<vmem>>, %arg4: memref<2x1x96xf32, #tpu.memory_space<vmem>>, %arg5: memref<2x32x32xf32, #tpu.memory_space<vmem>>, %arg6: memref<2x1x32xf32, #tpu.memory_space<vmem>>, %arg7: memref<2x32x64xf32, #tpu.memory_space<vmem>>, %arg8: memref<2x1x64xf32, #tpu.memory_space<vmem>>, %arg9: memref<2x64x32xf32, #tpu.memory_space<vmem>>, %arg10: memref<2x1x32xf32, #tpu.memory_space<vmem>>, %arg11: memref<2x4x32xf32, #tpu.memory_space<vmem>>, %arg12: memref<16x32xf32, #tpu.memory_space<vmem>>) attributes {dimension_semantics = [], scalar_prefetch = 0 : i64, scratch_operands = 0 : i64, tpu.core_type = #tpu.core_type<tc>} {
    %c0 = arith.constant 0 : index
    %c0_0 = arith.constant 0 : index
    %0 = vector.load %arg0[%c0, %c0_0] : memref<16x32xf32, #tpu.memory_space<vmem>>, vector<16x32xf32>
    %c0_1 = arith.constant 0 : index
    %c0_2 = arith.constant 0 : index
    %1 = vector.load %arg1[%c0_1, %c0_2] : memref<32x4xf32, #tpu.memory_space<vmem>>, vector<32x4xf32>
    %c0_3 = arith.constant 0 : index
    %c0_4 = arith.constant 0 : index
    %2 = vector.load %arg2[%c0_3, %c0_4] : memref<4x32xf32, #tpu.memory_space<vmem>>, vector<4x32xf32>
    %c0_5 = arith.constant 0 : index
    %c0_6 = arith.constant 0 : index
    %c0_7 = arith.constant 0 : index
    %3 = vector.load %arg3[%c0_5, %c0_6, %c0_7] : memref<2x32x96xf32, #tpu.memory_space<vmem>>, vector<1x32x96xf32>
    %4 = vector.shape_cast %3 : vector<1x32x96xf32> to vector<32x96xf32>
    %cst = arith.constant dense<0.000000e+00> : vector<16x96xf32>
    %5 = tpu.matmul %0, %4, %cst {dimension_numbers = #tpu.dot_dimension_numbers<[1], [0], [0], [1], [0, 0, 1, 1], [], []>} : vector<16x32xf32>, vector<32x96xf32>, vector<16x96xf32> -> vector<16x96xf32>
    %c0_8 = arith.constant 0 : index
    %c0_9 = arith.constant 0 : index
    %c0_10 = arith.constant 0 : index
    %6 = vector.load %arg4[%c0_8, %c0_9, %c0_10] : memref<2x1x96xf32, #tpu.memory_space<vmem>>, vector<1x1x96xf32>
    %7 = vector.shape_cast %6 : vector<1x1x96xf32> to vector<1x96xf32>
    %8 = vector.broadcast %7 : vector<1x96xf32> to vector<16x96xf32>
    %9 = arith.addf %5, %8 : vector<16x96xf32>
    %10 = vector.shape_cast %9 : vector<16x96xf32> to vector<2x8x96xf32>
    %11 = vector.extract_strided_slice %10 {offsets = [0, 0, 0], sizes = [2, 8, 32], strides = [1, 1, 1]} : vector<2x8x96xf32> to vector<2x8x32xf32>
    %12 = vector.extract_strided_slice %10 {offsets = [0, 0, 32], sizes = [2, 8, 32], strides = [1, 1, 1]} : vector<2x8x96xf32> to vector<2x8x32xf32>
    %13 = vector.extract_strided_slice %10 {offsets = [0, 0, 64], sizes = [2, 8, 32], strides = [1, 1, 1]} : vector<2x8x96xf32> to vector<2x8x32xf32>
    %14 = vector.shape_cast %11 : vector<2x8x32xf32> to vector<2x8x1x32xf32>
    %15 = vector.shape_cast %12 : vector<2x8x32xf32> to vector<2x1x8x32xf32>
    %16 = vector.broadcast %14 : vector<2x8x1x32xf32> to vector<2x8x8x32xf32>
    %17 = vector.broadcast %15 : vector<2x1x8x32xf32> to vector<2x8x8x32xf32>
    %18 = arith.mulf %16, %17 : vector<2x8x8x32xf32>
    %19 = vector.shape_cast %18 : vector<2x8x8x32xf32> to vector<128x32xf32>
    %cst_11 = arith.constant dense<0.000000e+00> : vector<128x4xf32>
    %20 = tpu.matmul %19, %1, %cst_11 {dimension_numbers = #tpu.dot_dimension_numbers<[1], [0], [0], [1], [0, 0, 1, 1], [], []>} : vector<128x32xf32>, vector<32x4xf32>, vector<128x4xf32> -> vector<128x4xf32>
    %21 = vector.shape_cast %20 : vector<128x4xf32> to vector<2x8x8x4xf32>
    %cst_12 = arith.constant dense<0xFF800000> : vector<2x8x4xf32>
    %22 = vector.multi_reduction <maximumf>, %21, %cst_12 [2] : vector<2x8x8x4xf32> to vector<2x8x4xf32>
    %23 = vector.shape_cast %22 : vector<2x8x4xf32> to vector<2x8x1x4xf32>
    %24 = vector.broadcast %23 : vector<2x8x1x4xf32> to vector<2x8x8x4xf32>
    %25 = arith.subf %21, %24 : vector<2x8x8x4xf32>
    %26 = math.exp %25 : vector<2x8x8x4xf32>
    %cst_13 = arith.constant dense<0.000000e+00> : vector<2x8x4xf32>
    %27 = vector.multi_reduction <add>, %26, %cst_13 [2] : vector<2x8x8x4xf32> to vector<2x8x4xf32>
    %28 = vector.shape_cast %27 : vector<2x8x4xf32> to vector<2x8x1x4xf32>
    %29 = vector.broadcast %28 : vector<2x8x1x4xf32> to vector<2x8x8x4xf32>
    %30 = arith.divf %26, %29 : vector<2x8x8x4xf32>
    %31 = vector.shape_cast %30 : vector<2x8x8x4xf32> to vector<128x4xf32>
    %cst_14 = arith.constant dense<0.000000e+00> : vector<128x32xf32>
    %32 = tpu.matmul %31, %2, %cst_14 {dimension_numbers = #tpu.dot_dimension_numbers<[1], [0], [0], [1], [0, 0, 1, 1], [], []>} : vector<128x4xf32>, vector<4x32xf32>, vector<128x32xf32> -> vector<128x32xf32>
    %33 = vector.shape_cast %32 : vector<128x32xf32> to vector<2x8x8x32xf32>
    %34 = vector.shape_cast %13 : vector<2x8x32xf32> to vector<2x1x8x32xf32>
    %35 = vector.broadcast %34 : vector<2x1x8x32xf32> to vector<2x8x8x32xf32>
    %36 = arith.mulf %33, %35 : vector<2x8x8x32xf32>
    %cst_15 = arith.constant dense<0.000000e+00> : vector<2x8x32xf32>
    %37 = vector.multi_reduction <add>, %36, %cst_15 [2] : vector<2x8x8x32xf32> to vector<2x8x32xf32>
    %38 = vector.shape_cast %37 : vector<2x8x32xf32> to vector<16x32xf32>
    %c0_16 = arith.constant 0 : index
    %c0_17 = arith.constant 0 : index
    %c0_18 = arith.constant 0 : index
    %39 = vector.load %arg5[%c0_16, %c0_17, %c0_18] : memref<2x32x32xf32, #tpu.memory_space<vmem>>, vector<1x32x32xf32>
    %40 = vector.shape_cast %39 : vector<1x32x32xf32> to vector<32x32xf32>
    %cst_19 = arith.constant dense<0.000000e+00> : vector<16x32xf32>
    %41 = tpu.matmul %38, %40, %cst_19 {dimension_numbers = #tpu.dot_dimension_numbers<[1], [0], [0], [1], [0, 0, 1, 1], [], []>} : vector<16x32xf32>, vector<32x32xf32>, vector<16x32xf32> -> vector<16x32xf32>
    %c0_20 = arith.constant 0 : index
    %c0_21 = arith.constant 0 : index
    %c0_22 = arith.constant 0 : index
    %42 = vector.load %arg6[%c0_20, %c0_21, %c0_22] : memref<2x1x32xf32, #tpu.memory_space<vmem>>, vector<1x1x32xf32>
    %43 = vector.shape_cast %42 : vector<1x1x32xf32> to vector<1x32xf32>
    %44 = vector.broadcast %43 : vector<1x32xf32> to vector<16x32xf32>
    %45 = arith.addf %41, %44 : vector<16x32xf32>
    %c0_23 = arith.constant 0 : index
    %c0_24 = arith.constant 0 : index
    %c0_25 = arith.constant 0 : index
    %46 = vector.load %arg11[%c0_23, %c0_24, %c0_25] : memref<2x4x32xf32, #tpu.memory_space<vmem>>, vector<1x4x32xf32>
    %47 = vector.shape_cast %46 : vector<1x4x32xf32> to vector<4x32xf32>
    %48 = arith.addf %0, %45 : vector<16x32xf32>
    %49 = vector.extract_strided_slice %47 {offsets = [0, 0], sizes = [1, 32], strides = [1, 1]} : vector<4x32xf32> to vector<1x32xf32>
    %50 = vector.extract_strided_slice %47 {offsets = [1, 0], sizes = [1, 32], strides = [1, 1]} : vector<4x32xf32> to vector<1x32xf32>
    %cst_26 = arith.constant dense<0.000000e+00> : vector<16xf32>
    %51 = vector.multi_reduction <add>, %48, %cst_26 [1] : vector<16x32xf32> to vector<16xf32>
    %52 = vector.shape_cast %51 : vector<16xf32> to vector<16x1xf32>
    %cst_27 = arith.constant 3.200000e+01 : f32
    %53 = vector.broadcast %cst_27 : f32 to vector<16x1xf32>
    %54 = arith.divf %52, %53 : vector<16x1xf32>
    %55 = arith.mulf %48, %48 : vector<16x32xf32>
    %cst_28 = arith.constant dense<0.000000e+00> : vector<16xf32>
    %56 = vector.multi_reduction <add>, %55, %cst_28 [1] : vector<16x32xf32> to vector<16xf32>
    %57 = vector.shape_cast %56 : vector<16xf32> to vector<16x1xf32>
    %cst_29 = arith.constant 3.200000e+01 : f32
    %58 = vector.broadcast %cst_29 : f32 to vector<16x1xf32>
    %59 = arith.divf %57, %58 : vector<16x1xf32>
    %60 = arith.mulf %54, %54 : vector<16x1xf32>
    %61 = arith.subf %59, %60 : vector<16x1xf32>
    %62 = vector.broadcast %54 : vector<16x1xf32> to vector<16x32xf32>
    %63 = arith.subf %48, %62 : vector<16x32xf32>
    %cst_30 = arith.constant 9.99999974E-6 : f32
    %64 = vector.broadcast %cst_30 : f32 to vector<16x1xf32>
    %65 = arith.addf %61, %64 : vector<16x1xf32>
    %66 = math.rsqrt %65 : vector<16x1xf32>
    %67 = vector.broadcast %66 : vector<16x1xf32> to vector<16x32xf32>
    %68 = arith.mulf %63, %67 : vector<16x32xf32>
    %69 = vector.broadcast %49 : vector<1x32xf32> to vector<16x32xf32>
    %70 = arith.mulf %68, %69 : vector<16x32xf32>
    %71 = vector.broadcast %50 : vector<1x32xf32> to vector<16x32xf32>
    %72 = arith.addf %70, %71 : vector<16x32xf32>
    %c0_31 = arith.constant 0 : index
    %c0_32 = arith.constant 0 : index
    %c0_33 = arith.constant 0 : index
    %73 = vector.load %arg7[%c0_31, %c0_32, %c0_33] : memref<2x32x64xf32, #tpu.memory_space<vmem>>, vector<1x32x64xf32>
    %74 = vector.shape_cast %73 : vector<1x32x64xf32> to vector<32x64xf32>
    %cst_34 = arith.constant dense<0.000000e+00> : vector<16x64xf32>
    %75 = tpu.matmul %72, %74, %cst_34 {dimension_numbers = #tpu.dot_dimension_numbers<[1], [0], [0], [1], [0, 0, 1, 1], [], []>} : vector<16x32xf32>, vector<32x64xf32>, vector<16x64xf32> -> vector<16x64xf32>
    %c0_35 = arith.constant 0 : index
    %c0_36 = arith.constant 0 : index
    %c0_37 = arith.constant 0 : index
    %76 = vector.load %arg8[%c0_35, %c0_36, %c0_37] : memref<2x1x64xf32, #tpu.memory_space<vmem>>, vector<1x1x64xf32>
    %77 = vector.shape_cast %76 : vector<1x1x64xf32> to vector<1x64xf32>
    %78 = vector.broadcast %77 : vector<1x64xf32> to vector<16x64xf32>
    %79 = arith.addf %75, %78 : vector<16x64xf32>
    %cst_38 = arith.constant 0.000000e+00 : f32
    %80 = vector.broadcast %cst_38 : f32 to vector<16x64xf32>
    %81 = arith.maximumf %79, %80 : vector<16x64xf32>
    %c0_39 = arith.constant 0 : index
    %c0_40 = arith.constant 0 : index
    %c0_41 = arith.constant 0 : index
    %82 = vector.load %arg9[%c0_39, %c0_40, %c0_41] : memref<2x64x32xf32, #tpu.memory_space<vmem>>, vector<1x64x32xf32>
    %83 = vector.shape_cast %82 : vector<1x64x32xf32> to vector<64x32xf32>
    %cst_42 = arith.constant dense<0.000000e+00> : vector<16x32xf32>
    %84 = tpu.matmul %81, %83, %cst_42 {dimension_numbers = #tpu.dot_dimension_numbers<[1], [0], [0], [1], [0, 0, 1, 1], [], []>} : vector<16x64xf32>, vector<64x32xf32>, vector<16x32xf32> -> vector<16x32xf32>
    %c0_43 = arith.constant 0 : index
    %c0_44 = arith.constant 0 : index
    %c0_45 = arith.constant 0 : index
    %85 = vector.load %arg10[%c0_43, %c0_44, %c0_45] : memref<2x1x32xf32, #tpu.memory_space<vmem>>, vector<1x1x32xf32>
    %86 = vector.shape_cast %85 : vector<1x1x32xf32> to vector<1x32xf32>
    %87 = vector.broadcast %86 : vector<1x32xf32> to vector<16x32xf32>
    %88 = arith.addf %84, %87 : vector<16x32xf32>
    %89 = arith.addf %72, %88 : vector<16x32xf32>
    %90 = vector.extract_strided_slice %47 {offsets = [2, 0], sizes = [1, 32], strides = [1, 1]} : vector<4x32xf32> to vector<1x32xf32>
    %91 = vector.extract_strided_slice %47 {offsets = [3, 0], sizes = [1, 32], strides = [1, 1]} : vector<4x32xf32> to vector<1x32xf32>
    %cst_46 = arith.constant dense<0.000000e+00> : vector<16xf32>
    %92 = vector.multi_reduction <add>, %89, %cst_46 [1] : vector<16x32xf32> to vector<16xf32>
    %93 = vector.shape_cast %92 : vector<16xf32> to vector<16x1xf32>
    %cst_47 = arith.constant 3.200000e+01 : f32
    %94 = vector.broadcast %cst_47 : f32 to vector<16x1xf32>
    %95 = arith.divf %93, %94 : vector<16x1xf32>
    %96 = arith.mulf %89, %89 : vector<16x32xf32>
    %cst_48 = arith.constant dense<0.000000e+00> : vector<16xf32>
    %97 = vector.multi_reduction <add>, %96, %cst_48 [1] : vector<16x32xf32> to vector<16xf32>
    %98 = vector.shape_cast %97 : vector<16xf32> to vector<16x1xf32>
    %cst_49 = arith.constant 3.200000e+01 : f32
    %99 = vector.broadcast %cst_49 : f32 to vector<16x1xf32>
    %100 = arith.divf %98, %99 : vector<16x1xf32>
    %101 = arith.mulf %95, %95 : vector<16x1xf32>
    %102 = arith.subf %100, %101 : vector<16x1xf32>
    %103 = vector.broadcast %95 : vector<16x1xf32> to vector<16x32xf32>
    %104 = arith.subf %89, %103 : vector<16x32xf32>
    %cst_50 = arith.constant 9.99999974E-6 : f32
    %105 = vector.broadcast %cst_50 : f32 to vector<16x1xf32>
    %106 = arith.addf %102, %105 : vector<16x1xf32>
    %107 = math.rsqrt %106 : vector<16x1xf32>
    %108 = vector.broadcast %107 : vector<16x1xf32> to vector<16x32xf32>
    %109 = arith.mulf %104, %108 : vector<16x32xf32>
    %110 = vector.broadcast %90 : vector<1x32xf32> to vector<16x32xf32>
    %111 = arith.mulf %109, %110 : vector<16x32xf32>
    %112 = vector.broadcast %91 : vector<1x32xf32> to vector<16x32xf32>
    %113 = arith.addf %111, %112 : vector<16x32xf32>
    %c1 = arith.constant 1 : index
    %c0_51 = arith.constant 0 : index
    %c0_52 = arith.constant 0 : index
    %114 = vector.load %arg3[%c1, %c0_51, %c0_52] : memref<2x32x96xf32, #tpu.memory_space<vmem>>, vector<1x32x96xf32>
    %115 = vector.shape_cast %114 : vector<1x32x96xf32> to vector<32x96xf32>
    %cst_53 = arith.constant dense<0.000000e+00> : vector<16x96xf32>
    %116 = tpu.matmul %113, %115, %cst_53 {dimension_numbers = #tpu.dot_dimension_numbers<[1], [0], [0], [1], [0, 0, 1, 1], [], []>} : vector<16x32xf32>, vector<32x96xf32>, vector<16x96xf32> -> vector<16x96xf32>
    %c1_54 = arith.constant 1 : index
    %c0_55 = arith.constant 0 : index
    %c0_56 = arith.constant 0 : index
    %117 = vector.load %arg4[%c1_54, %c0_55, %c0_56] : memref<2x1x96xf32, #tpu.memory_space<vmem>>, vector<1x1x96xf32>
    %118 = vector.shape_cast %117 : vector<1x1x96xf32> to vector<1x96xf32>
    %119 = vector.broadcast %118 : vector<1x96xf32> to vector<16x96xf32>
    %120 = arith.addf %116, %119 : vector<16x96xf32>
    %121 = vector.shape_cast %120 : vector<16x96xf32> to vector<2x8x96xf32>
    %122 = vector.extract_strided_slice %121 {offsets = [0, 0, 0], sizes = [2, 8, 32], strides = [1, 1, 1]} : vector<2x8x96xf32> to vector<2x8x32xf32>
    %123 = vector.extract_strided_slice %121 {offsets = [0, 0, 32], sizes = [2, 8, 32], strides = [1, 1, 1]} : vector<2x8x96xf32> to vector<2x8x32xf32>
    %124 = vector.extract_strided_slice %121 {offsets = [0, 0, 64], sizes = [2, 8, 32], strides = [1, 1, 1]} : vector<2x8x96xf32> to vector<2x8x32xf32>
    %125 = vector.shape_cast %122 : vector<2x8x32xf32> to vector<2x8x1x32xf32>
    %126 = vector.shape_cast %123 : vector<2x8x32xf32> to vector<2x1x8x32xf32>
    %127 = vector.broadcast %125 : vector<2x8x1x32xf32> to vector<2x8x8x32xf32>
    %128 = vector.broadcast %126 : vector<2x1x8x32xf32> to vector<2x8x8x32xf32>
    %129 = arith.mulf %127, %128 : vector<2x8x8x32xf32>
    %130 = vector.shape_cast %129 : vector<2x8x8x32xf32> to vector<128x32xf32>
    %cst_57 = arith.constant dense<0.000000e+00> : vector<128x4xf32>
    %131 = tpu.matmul %130, %1, %cst_57 {dimension_numbers = #tpu.dot_dimension_numbers<[1], [0], [0], [1], [0, 0, 1, 1], [], []>} : vector<128x32xf32>, vector<32x4xf32>, vector<128x4xf32> -> vector<128x4xf32>
    %132 = vector.shape_cast %131 : vector<128x4xf32> to vector<2x8x8x4xf32>
    %cst_58 = arith.constant dense<0xFF800000> : vector<2x8x4xf32>
    %133 = vector.multi_reduction <maximumf>, %132, %cst_58 [2] : vector<2x8x8x4xf32> to vector<2x8x4xf32>
    %134 = vector.shape_cast %133 : vector<2x8x4xf32> to vector<2x8x1x4xf32>
    %135 = vector.broadcast %134 : vector<2x8x1x4xf32> to vector<2x8x8x4xf32>
    %136 = arith.subf %132, %135 : vector<2x8x8x4xf32>
    %137 = math.exp %136 : vector<2x8x8x4xf32>
    %cst_59 = arith.constant dense<0.000000e+00> : vector<2x8x4xf32>
    %138 = vector.multi_reduction <add>, %137, %cst_59 [2] : vector<2x8x8x4xf32> to vector<2x8x4xf32>
    %139 = vector.shape_cast %138 : vector<2x8x4xf32> to vector<2x8x1x4xf32>
    %140 = vector.broadcast %139 : vector<2x8x1x4xf32> to vector<2x8x8x4xf32>
    %141 = arith.divf %137, %140 : vector<2x8x8x4xf32>
    %142 = vector.shape_cast %141 : vector<2x8x8x4xf32> to vector<128x4xf32>
    %cst_60 = arith.constant dense<0.000000e+00> : vector<128x32xf32>
    %143 = tpu.matmul %142, %2, %cst_60 {dimension_numbers = #tpu.dot_dimension_numbers<[1], [0], [0], [1], [0, 0, 1, 1], [], []>} : vector<128x4xf32>, vector<4x32xf32>, vector<128x32xf32> -> vector<128x32xf32>
    %144 = vector.shape_cast %143 : vector<128x32xf32> to vector<2x8x8x32xf32>
    %145 = vector.shape_cast %124 : vector<2x8x32xf32> to vector<2x1x8x32xf32>
    %146 = vector.broadcast %145 : vector<2x1x8x32xf32> to vector<2x8x8x32xf32>
    %147 = arith.mulf %144, %146 : vector<2x8x8x32xf32>
    %cst_61 = arith.constant dense<0.000000e+00> : vector<2x8x32xf32>
    %148 = vector.multi_reduction <add>, %147, %cst_61 [2] : vector<2x8x8x32xf32> to vector<2x8x32xf32>
    %149 = vector.shape_cast %148 : vector<2x8x32xf32> to vector<16x32xf32>
    %c1_62 = arith.constant 1 : index
    %c0_63 = arith.constant 0 : index
    %c0_64 = arith.constant 0 : index
    %150 = vector.load %arg5[%c1_62, %c0_63, %c0_64] : memref<2x32x32xf32, #tpu.memory_space<vmem>>, vector<1x32x32xf32>
    %151 = vector.shape_cast %150 : vector<1x32x32xf32> to vector<32x32xf32>
    %cst_65 = arith.constant dense<0.000000e+00> : vector<16x32xf32>
    %152 = tpu.matmul %149, %151, %cst_65 {dimension_numbers = #tpu.dot_dimension_numbers<[1], [0], [0], [1], [0, 0, 1, 1], [], []>} : vector<16x32xf32>, vector<32x32xf32>, vector<16x32xf32> -> vector<16x32xf32>
    %c1_66 = arith.constant 1 : index
    %c0_67 = arith.constant 0 : index
    %c0_68 = arith.constant 0 : index
    %153 = vector.load %arg6[%c1_66, %c0_67, %c0_68] : memref<2x1x32xf32, #tpu.memory_space<vmem>>, vector<1x1x32xf32>
    %154 = vector.shape_cast %153 : vector<1x1x32xf32> to vector<1x32xf32>
    %155 = vector.broadcast %154 : vector<1x32xf32> to vector<16x32xf32>
    %156 = arith.addf %152, %155 : vector<16x32xf32>
    %c1_69 = arith.constant 1 : index
    %c0_70 = arith.constant 0 : index
    %c0_71 = arith.constant 0 : index
    %157 = vector.load %arg11[%c1_69, %c0_70, %c0_71] : memref<2x4x32xf32, #tpu.memory_space<vmem>>, vector<1x4x32xf32>
    %158 = vector.shape_cast %157 : vector<1x4x32xf32> to vector<4x32xf32>
    %159 = arith.addf %113, %156 : vector<16x32xf32>
    %160 = vector.extract_strided_slice %158 {offsets = [0, 0], sizes = [1, 32], strides = [1, 1]} : vector<4x32xf32> to vector<1x32xf32>
    %161 = vector.extract_strided_slice %158 {offsets = [1, 0], sizes = [1, 32], strides = [1, 1]} : vector<4x32xf32> to vector<1x32xf32>
    %cst_72 = arith.constant dense<0.000000e+00> : vector<16xf32>
    %162 = vector.multi_reduction <add>, %159, %cst_72 [1] : vector<16x32xf32> to vector<16xf32>
    %163 = vector.shape_cast %162 : vector<16xf32> to vector<16x1xf32>
    %cst_73 = arith.constant 3.200000e+01 : f32
    %164 = vector.broadcast %cst_73 : f32 to vector<16x1xf32>
    %165 = arith.divf %163, %164 : vector<16x1xf32>
    %166 = arith.mulf %159, %159 : vector<16x32xf32>
    %cst_74 = arith.constant dense<0.000000e+00> : vector<16xf32>
    %167 = vector.multi_reduction <add>, %166, %cst_74 [1] : vector<16x32xf32> to vector<16xf32>
    %168 = vector.shape_cast %167 : vector<16xf32> to vector<16x1xf32>
    %cst_75 = arith.constant 3.200000e+01 : f32
    %169 = vector.broadcast %cst_75 : f32 to vector<16x1xf32>
    %170 = arith.divf %168, %169 : vector<16x1xf32>
    %171 = arith.mulf %165, %165 : vector<16x1xf32>
    %172 = arith.subf %170, %171 : vector<16x1xf32>
    %173 = vector.broadcast %165 : vector<16x1xf32> to vector<16x32xf32>
    %174 = arith.subf %159, %173 : vector<16x32xf32>
    %cst_76 = arith.constant 9.99999974E-6 : f32
    %175 = vector.broadcast %cst_76 : f32 to vector<16x1xf32>
    %176 = arith.addf %172, %175 : vector<16x1xf32>
    %177 = math.rsqrt %176 : vector<16x1xf32>
    %178 = vector.broadcast %177 : vector<16x1xf32> to vector<16x32xf32>
    %179 = arith.mulf %174, %178 : vector<16x32xf32>
    %180 = vector.broadcast %160 : vector<1x32xf32> to vector<16x32xf32>
    %181 = arith.mulf %179, %180 : vector<16x32xf32>
    %182 = vector.broadcast %161 : vector<1x32xf32> to vector<16x32xf32>
    %183 = arith.addf %181, %182 : vector<16x32xf32>
    %c1_77 = arith.constant 1 : index
    %c0_78 = arith.constant 0 : index
    %c0_79 = arith.constant 0 : index
    %184 = vector.load %arg7[%c1_77, %c0_78, %c0_79] : memref<2x32x64xf32, #tpu.memory_space<vmem>>, vector<1x32x64xf32>
    %185 = vector.shape_cast %184 : vector<1x32x64xf32> to vector<32x64xf32>
    %cst_80 = arith.constant dense<0.000000e+00> : vector<16x64xf32>
    %186 = tpu.matmul %183, %185, %cst_80 {dimension_numbers = #tpu.dot_dimension_numbers<[1], [0], [0], [1], [0, 0, 1, 1], [], []>} : vector<16x32xf32>, vector<32x64xf32>, vector<16x64xf32> -> vector<16x64xf32>
    %c1_81 = arith.constant 1 : index
    %c0_82 = arith.constant 0 : index
    %c0_83 = arith.constant 0 : index
    %187 = vector.load %arg8[%c1_81, %c0_82, %c0_83] : memref<2x1x64xf32, #tpu.memory_space<vmem>>, vector<1x1x64xf32>
    %188 = vector.shape_cast %187 : vector<1x1x64xf32> to vector<1x64xf32>
    %189 = vector.broadcast %188 : vector<1x64xf32> to vector<16x64xf32>
    %190 = arith.addf %186, %189 : vector<16x64xf32>
    %cst_84 = arith.constant 0.000000e+00 : f32
    %191 = vector.broadcast %cst_84 : f32 to vector<16x64xf32>
    %192 = arith.maximumf %190, %191 : vector<16x64xf32>
    %c1_85 = arith.constant 1 : index
    %c0_86 = arith.constant 0 : index
    %c0_87 = arith.constant 0 : index
    %193 = vector.load %arg9[%c1_85, %c0_86, %c0_87] : memref<2x64x32xf32, #tpu.memory_space<vmem>>, vector<1x64x32xf32>
    %194 = vector.shape_cast %193 : vector<1x64x32xf32> to vector<64x32xf32>
    %cst_88 = arith.constant dense<0.000000e+00> : vector<16x32xf32>
    %195 = tpu.matmul %192, %194, %cst_88 {dimension_numbers = #tpu.dot_dimension_numbers<[1], [0], [0], [1], [0, 0, 1, 1], [], []>} : vector<16x64xf32>, vector<64x32xf32>, vector<16x32xf32> -> vector<16x32xf32>
    %c1_89 = arith.constant 1 : index
    %c0_90 = arith.constant 0 : index
    %c0_91 = arith.constant 0 : index
    %196 = vector.load %arg10[%c1_89, %c0_90, %c0_91] : memref<2x1x32xf32, #tpu.memory_space<vmem>>, vector<1x1x32xf32>
    %197 = vector.shape_cast %196 : vector<1x1x32xf32> to vector<1x32xf32>
    %198 = vector.broadcast %197 : vector<1x32xf32> to vector<16x32xf32>
    %199 = arith.addf %195, %198 : vector<16x32xf32>
    %200 = arith.addf %183, %199 : vector<16x32xf32>
    %201 = vector.extract_strided_slice %158 {offsets = [2, 0], sizes = [1, 32], strides = [1, 1]} : vector<4x32xf32> to vector<1x32xf32>
    %202 = vector.extract_strided_slice %158 {offsets = [3, 0], sizes = [1, 32], strides = [1, 1]} : vector<4x32xf32> to vector<1x32xf32>
    %cst_92 = arith.constant dense<0.000000e+00> : vector<16xf32>
    %203 = vector.multi_reduction <add>, %200, %cst_92 [1] : vector<16x32xf32> to vector<16xf32>
    %204 = vector.shape_cast %203 : vector<16xf32> to vector<16x1xf32>
    %cst_93 = arith.constant 3.200000e+01 : f32
    %205 = vector.broadcast %cst_93 : f32 to vector<16x1xf32>
    %206 = arith.divf %204, %205 : vector<16x1xf32>
    %207 = arith.mulf %200, %200 : vector<16x32xf32>
    %cst_94 = arith.constant dense<0.000000e+00> : vector<16xf32>
    %208 = vector.multi_reduction <add>, %207, %cst_94 [1] : vector<16x32xf32> to vector<16xf32>
    %209 = vector.shape_cast %208 : vector<16xf32> to vector<16x1xf32>
    %cst_95 = arith.constant 3.200000e+01 : f32
    %210 = vector.broadcast %cst_95 : f32 to vector<16x1xf32>
    %211 = arith.divf %209, %210 : vector<16x1xf32>
    %212 = arith.mulf %206, %206 : vector<16x1xf32>
    %213 = arith.subf %211, %212 : vector<16x1xf32>
    %214 = vector.broadcast %206 : vector<16x1xf32> to vector<16x32xf32>
    %215 = arith.subf %200, %214 : vector<16x32xf32>
    %cst_96 = arith.constant 9.99999974E-6 : f32
    %216 = vector.broadcast %cst_96 : f32 to vector<16x1xf32>
    %217 = arith.addf %213, %216 : vector<16x1xf32>
    %218 = math.rsqrt %217 : vector<16x1xf32>
    %219 = vector.broadcast %218 : vector<16x1xf32> to vector<16x32xf32>
    %220 = arith.mulf %215, %219 : vector<16x32xf32>
    %221 = vector.broadcast %201 : vector<1x32xf32> to vector<16x32xf32>
    %222 = arith.mulf %220, %221 : vector<16x32xf32>
    %223 = vector.broadcast %202 : vector<1x32xf32> to vector<16x32xf32>
    %224 = arith.addf %222, %223 : vector<16x32xf32>
    %c0_97 = arith.constant 0 : index
    %c0_98 = arith.constant 0 : index
    %225 = vector.load %arg12[%c0_97, %c0_98] : memref<16x32xf32, #tpu.memory_space<vmem>>, vector<16x32xf32>
    tpu.vector_store %arg12[%c0_97, %c0_98], %224 {strides = array<i32>} : memref<16x32xf32, #tpu.memory_space<vmem>>, vector<16x32xf32>,
    return
  }
}

</mosaic_0001>

<bundles_post_ra>
// kernel: tpu_custom_call.1
= control target key start
LH: loop header
LB: loop body
LE: loop exit
PB: predicated region body
PF: predicated region fallthrough
CT: control target
= control target key end

     0   :  { %17 = vsyncpa [#allocation3], 0  ;;  %s4992_s0 = inlined_call_operand.hbm [shape: f32[16,32], index: 0, kind: input, shape index: {}]   ;;  %s4993_s1 = inlined_call_operand.vmem [shape: f32[32,4], index: 1, kind: input, shape index: {}]   ;;  %s4994_s2 = inlined_call_operand.hbm [shape: f32[4,32], index: 2, kind: input, shape index: {}]   ;;  %s4995_s3 = inlined_call_operand.vmem [shape: f32[2,32,96], index: 3, kind: input, shape index: {}]   ;;  %s4996_s4 = inlined_call_operand.hbm [shape: f32[2,1,96], index: 4, kind: input, shape index: {}]   ;;  %s4997_s5 = inlined_call_operand.vmem [shape: f32[2,32,32], index: 5, kind: input, shape index: {}]   ;;  %s4998_s6 = inlined_call_operand.hbm [shape: f32[2,1,32], index: 6, kind: input, shape index: {}]   ;;  %s4999_s7 = inlined_call_operand.vmem [shape: f32[2,32,64], index: 7, kind: input, shape index: {}]   ;;  %s5000_s8 = inlined_call_operand.hbm [shape: f32[2,1,64], index: 8, kind: input, shape index: {}]   ;;  %s5001_s9 = inlined_call_operand.vmem [shape: f32[2,64,32], index: 9, kind: input, shape index: {}]   ;;  %s5002_s10 = inlined_call_operand.hbm [shape: f32[2,1,32], index: 10, kind: input, shape index: {}]   ;;  %s5003_s11 = inlined_call_operand.vmem [shape: f32[2,4,32], index: 11, kind: input, shape index: {}]   ;;  %s5004_s12 = inlined_call_operand.hbm [shape: f32[16,32], index: 12, kind: output, shape index: {}]  }
   0x1   :  { %18 = vsyncpa [#allocation6], 0 }
   0x2   :  { %19 = vsyncpa [#allocation9], 0 }
   0x3   :  { %20 = vsyncpa [#allocation12], 0 }
   0x4   :  { %21 = vsyncpa [#allocation4], 0  ;;  %s4091_s21 = smov [#allocation5]   ;;  %s3927_s25 = scalar_lea.hbm %s4994_s2, 64 }
   0x5   :  { %s42_s22 = sshll.u32 %s4091_s21, 4  ;;  %p3928_p0 = scmp.ne.s32.totalorder %s4994_s2, %s3927_s25  ;;  %s43_s22 = int_to_ptr.vmem [resolvable:$true] %s42_s22 }
   0x6   :  { %p3931_p1 = scmp.lt.u32.totalorder %s3927_s25, %s4994_s2 }
   0x8   :  { %p3933_p2 = pnand %p3931_p1, %p3928_p0 }
   0xa   :  { %3936 = shalt.err (!%p3933_p2)
}
   0xb   :  { %s3937_s30 = scalar_lea.vmem %s43_s22, 64  ;;  %p3942_p4 = scmp.lt.s32.totalorder %s43_s22, %s43_s22 }
   0xc   :  { %p3938_p3 = scmp.ne.s32.totalorder %s43_s22, %s3937_s30  ;;  %p3943_p5 = scmp.lt.s32.totalorder %s3937_s30, %s3937_s30 }
   0xe   :  { %p3944_p6 = por %p3943_p5, %p3942_p4 }
  0x10   :  { %p3945_p7 = pnand %p3944_p6, %p3938_p3 }
  0x12   :  { %3948 = shalt.err (!%p3945_p7)
}
  0x13   :  { %45 = dma.hbm_to_vmem [thread:$0]  %s4994_s2, 64, %s43_s22, [#allocation6]  }
  0x14   :  { %s4092_s15 = smov [#allocation8]   ;;  %s4093_s17 = smov [#allocation2]  }
  0x15   :  { %s67_s16 = sshll.u32 %s4092_s15, 4  ;;  %s27_s18 = sshll.u32 %s4093_s17, 4  ;;  %s68_s16 = int_to_ptr.vmem [resolvable:$true] %s67_s16  ;;  %s28_s18 = int_to_ptr.vmem [resolvable:$true] %s27_s18 }
  0x16   :  { %s3949_s21 = scalar_lea.hbm %s4998_s6, 32 }
  0x17   :  { %p3950_p8 = scmp.ne.s32.totalorder %s4998_s6, %s3949_s21  ;;  %p3953_p9 = scmp.lt.u32.totalorder %s3949_s21, %s4998_s6 }
  0x19   :  { %p3955_p10 = pnand %p3953_p9, %p3950_p8 }
  0x1b   :  { %3958 = shalt.err (!%p3955_p10)
}
  0x1c   :  { %s3959_s2 = scalar_lea.vmem %s68_s16, 32  ;;  %p3964_p12 = scmp.lt.s32.totalorder %s68_s16, %s68_s16 }
  0x1d   :  { %p3960_p11 = scmp.ne.s32.totalorder %s68_s16, %s3959_s2  ;;  %p3965_p13 = scmp.lt.s32.totalorder %s3959_s2, %s3959_s2 }
  0x1f   :  { %p3966_p0 = por %p3965_p13, %p3964_p12 }
  0x21   :  { %p3967_p1 = pnand %p3966_p0, %p3960_p11 }
  0x23   :  { %3970 = shalt.err (!%p3967_p1)
}
  0x24   :  { %s4094_s22 = smov 16   ;;  %s4095_s27 = smov 1  }
  0x25   :  { %73 = dma.hbm_to_vmem [thread:$0]  %s4998_s6, 32, %s68_s16, [#allocation9], %s4094_s22, %s4094_s22, %s4095_s27  }
  0x26   :  { %s3971_s14 = scalar_lea.hbm %s4992_s0, 256 }
  0x27   :  { %p3972_p2 = scmp.ne.s32.totalorder %s4992_s0, %s3971_s14  ;;  %p3975_p3 = scmp.lt.u32.totalorder %s3971_s14, %s4992_s0 }
  0x29   :  { %p3977_p4 = pnand %p3975_p3, %p3972_p2 }
  0x2b   :  { %3980 = shalt.err (!%p3977_p4)
}
  0x2c   :  { %s3981_s21 = scalar_lea.vmem %s28_s18, 256  ;;  %p3986_p6 = scmp.lt.s32.totalorder %s28_s18, %s28_s18 }
  0x2d   :  { %p3982_p5 = scmp.ne.s32.totalorder %s28_s18, %s3981_s21  ;;  %p3987_p7 = scmp.lt.s32.totalorder %s3981_s21, %s3981_s21 }
  0x2f   :  { %p3988_p8 = por %p3987_p7, %p3986_p6 }
  0x31   :  { %p3989_p9 = pnand %p3988_p8, %p3982_p5 }
  0x33   :  { %3992 = shalt.err (!%p3989_p9)
}
  0x34   :  { %s4096_s6 = smov 128   ;;  %s4097_s16 = smov 8  }
  0x35   :  { %33 = dma.hbm_to_vmem [thread:$0]  %s4992_s0, 256, %s28_s18, [#allocation3], %s4096_s6, %s4096_s6, %s4097_s16  }
  0x36   :  { %s4098_s25 = smov [#allocation7]   ;;  %s4099_s2 = smov [#allocation10]  }
  0x37   :  { %s53_s26 = sshll.u32 %s4098_s25, 4  ;;  %s81_s28 = sshll.u32 %s4099_s2, 4  ;;  %s54_s26 = int_to_ptr.vmem [resolvable:$true] %s53_s26  ;;  %s82_s28 = int_to_ptr.vmem [resolvable:$true] %s81_s28 }
  0x38   :  { %s3993_s13 = scalar_lea.hbm %s4996_s4, 32 }
  0x39   :  { %p3994_p10 = scmp.ne.s32.totalorder %s4996_s4, %s3993_s13  ;;  %p3997_p11 = scmp.lt.u32.totalorder %s3993_s13, %s4996_s4 }
  0x3b   :  { %p3999_p12 = pnand %p3997_p11, %p3994_p10 }
  0x3d   :  { %4002 = shalt.err (!%p3999_p12)
}
  0x3e   :  { %s4003_s0 = scalar_lea.vmem %s54_s26, 32  ;;  %p4008_p0 = scmp.lt.s32.totalorder %s54_s26, %s54_s26 }
  0x3f   :  { %p4004_p13 = scmp.ne.s32.totalorder %s54_s26, %s4003_s0  ;;  %p4009_p1 = scmp.lt.s32.totalorder %s4003_s0, %s4003_s0 }
  0x41   :  { %p4010_p2 = por %p4009_p1, %p4008_p0 }
  0x43   :  { %p4011_p3 = pnand %p4010_p2, %p4004_p13 }
  0x45   :  { %4014 = shalt.err (!%p4011_p3)
}
  0x46   :  { %59 = dma.hbm_to_vmem [thread:$0]  %s4996_s4, 32, %s54_s26, [#allocation6], %s4094_s22, %s4094_s22, %s4095_s27  }
  0x47   :  { %s4015_s24 = scalar_lea.hbm %s5000_s8, 32 }
  0x48   :  { %p4016_p4 = scmp.ne.s32.totalorder %s5000_s8, %s4015_s24  ;;  %p4019_p5 = scmp.lt.u32.totalorder %s4015_s24, %s5000_s8 }
  0x4a   :  { %p4021_p6 = pnand %p4019_p5, %p4016_p4 }
  0x4c   :  { %4024 = shalt.err (!%p4021_p6)
}
  0x4d   :  { %s4025_s13 = scalar_lea.vmem %s82_s28, 32  ;;  %p4030_p8 = scmp.lt.s32.totalorder %s82_s28, %s82_s28 }
  0x4e   :  { %p4026_p7 = scmp.ne.s32.totalorder %s82_s28, %s4025_s13  ;;  %p4031_p9 = scmp.lt.s32.totalorder %s4025_s13, %s4025_s13 }
  0x50   :  { %p4032_p10 = por %p4031_p9, %p4030_p8 }
  0x52   :  { %p4033_p11 = pnand %p4032_p10, %p4026_p7 }
  0x54   :  { %4036 = shalt.err (!%p4033_p11)
}
  0x55   :  { %87 = dma.hbm_to_vmem [thread:$0]  %s5000_s8, 32, %s82_s28, [#allocation9], %s4094_s22, %s4094_s22, %s4095_s27  }
  0x56   :  { %s4100_s14 = smov [#allocation11]   ;;  %s4037_s0 = scalar_lea.hbm %s5002_s10, 32 }
  0x57   :  { %s95_s15 = sshll.u32 %s4100_s14, 4  ;;  %p4038_p12 = scmp.ne.s32.totalorder %s5002_s10, %s4037_s0  ;;  %s96_s15 = int_to_ptr.vmem [resolvable:$true] %s95_s15 }
  0x58   :  { %p4041_p13 = scmp.lt.u32.totalorder %s4037_s0, %s5002_s10 }
  0x5a   :  { %p4043_p0 = pnand %p4041_p13, %p4038_p12 }
  0x5c   :  { %4046 = shalt.err (!%p4043_p0)
}
  0x5d   :  { %s4047_s24 = scalar_lea.vmem %s96_s15, 32  ;;  %p4052_p2 = scmp.lt.s32.totalorder %s96_s15, %s96_s15 }
  0x5e   :  { %p4048_p1 = scmp.ne.s32.totalorder %s96_s15, %s4047_s24  ;;  %p4053_p3 = scmp.lt.s32.totalorder %s4047_s24, %s4047_s24 }
  0x60   :  { %p4054_p4 = por %p4053_p3, %p4052_p2 }
  0x62   :  { %p4055_p5 = pnand %p4054_p4, %p4048_p1 }
  0x64   :  { %4058 = shalt.err (!%p4055_p5)
}
  0x65   :  { %101 = dma.hbm_to_vmem [thread:$0]  %s5002_s10, 32, %s96_s15, [#allocation12], %s4094_s22, %s4094_s22, %s4095_s27  }
  0x66   :  { %4081 = dma.done.wait [#allocation3], 256  }
  0x67   :  { %4082 = vsyncadd [#allocation3], 4294967040 }
  0x68   :  { %4083 = dma.done.wait [#allocation6], 96  }
  0x69   :  { %4084 = vsyncadd [#allocation6], 4294967200 }
  0x6a   :  { %4085 = dma.done.wait [#allocation9], 64  }
  0x6b   :  { %4086 = vsyncadd [#allocation9], 4294967232 }
  0x6c   :  { %4087 = dma.done.wait [#allocation12], 32  }
  0x6d   :  { %4088 = vsyncadd [#allocation12], 4294967264  ;;  %vm140_vm0 = vcmask 261120   ;;  %v129_v0 = vld [vmem:[%s4995_s3] sm:$0xff]  ;;  %v130_v1 = vld [vmem:[%s4995_s3 + $0x8] sm:$0xff]  ;;  %s4101_s20 = smov 64   ;;  %v228_v21 = vlaneseq }
  0x6e   :  { %v131_v2 = vld [vmem:[%s4995_s3 + $0x10] sm:$0xff]  ;;  %v3670_v3 = vpack.c.bf16 %v130_v1, %v129_v0  ;;  %v132_v4 = vld [vmem:[%s4995_s3 + $0x18] sm:$0xff]  ;;  %v122_v5 = vld [vmem:[#allocation2] sm:$0xff]  ;;  %s4102_s21 = smov 96   ;;  %v4103_v19 = vmov 1966171168  }
  0x6f   :  { %v3674_v6 = vpack.c.bf16 %v132_v4, %v131_v2  ;;  %3458 = vmatprep.mubr.msk.f32.mxu1 %vm140_vm0, %v122_v5  ;;  %v123_v7 = vld [vmem:[#allocation2 + $0x8] sm:$0xff]  ;;  %v124_v8 = vld [vmem:[%s4993_s1] sm:$0xff]  ;;  %v126_v10 = vld [vmem:[%s4993_s1 + $0x10] sm:$0xff]  ;;  %v226_v20 = vunpack.c.l.s4 %v4103_v19  ;;  %v4295_v23 = vshrl.u32 %v228_v21, 7  ;;  %vm970_vm1 = vcmask 1043456  }
  0x70   :  { %3671 = vmatprep.subr.bf16.mxu1 %v3670_v3  ;;  %v125_v9 = vld [vmem:[%s4993_s1 + $0x8] sm:$0xff]  ;;  %v127_v12 = vld [vmem:[%s4993_s1 + $0x18] sm:$0xff]  ;;  %v3209_v14 = vld [vmem:[#allocation7] ss:$0 sm:$0xff]  ;;  %vm617_vm2 = vcmask 31744   ;;  %vm1280_vm3 = vcmask 1041409  }
  0x71   :  { %3673 = vmatpush3.bf16.msra.mxu1 %v3670_v3  ;;  %v4280_v11 = vpack.c.bf16 %v125_v9, %v124_v8  ;;  %v4285_v13 = vpack.c.bf16 %v127_v12, %v126_v10  ;;  %v227_v22 = vunpack.c.0.s8 %v226_v20  ;;  %v4303_v29 = vsub.s32 0, %v4295_v23 }
  0x72   :  { %3675 = vmatprep.subr.bf16.mxu1 %v3674_v6  ;;  %vm1282_vm4 = vcmask 1042434   ;;  %vm1284_vm5 = vcmask 1043459   ;;  %vm1286_vm6 = vcmask 1044484   ;;  %vm1288_vm7 = vcmask 1045509  }
  0x73   :  { %v4298_v24 = vsub.s32 %v227_v22, %v4295_v23  ;;  %vm1290_vm8 = vcmask 1046534   ;;  %vm1292_vm9 = vcmask 1047559   ;;  %vm1535_vm10 = vcmask 523264  }
  0x75   :  { %3677 = vmatpush3.bf16.msra.mxu1 %v3674_v6 }
  0x76   :  { %3679 = vmatprep.subr.bf16.mxu1 %v4280_v11 }
  0x78   :  { %3459 = vmatmul.mubr.msk.f32.vlgmr.msra.gmra.mrb[0].mxu1 %vm140_vm0, %v123_v7 }
  0x79   :  { %3681 = vmatpush3.bf16.msra.mxu1 %v4280_v11 }
  0x7a   :  { %3683 = vmatprep.subr.bf16.mxu1 %v4285_v13 }
  0x7d   :  { %3685 = vmatpush3.bf16.msra.mxu1 %v4285_v13 }
 0x14b   :  { %v3460_v15 = vpop.f32.mrb[0].mxu1 }
 0x14c   :  { %v213_v16 = vpop.f32.mrb[1].mxu1  ;;  %v219_v18 = vadd.f32 %v3460_v15, %v3209_v14 }
 0x14d   :  { %v214_v17 = vadd.f32 %v3209_v14, %v213_v16 }
 0x14e   :  { %v280_v43 = vrot.slane %v219_v18, %v4298_v24  ;;  %v273_v50 = vcombine.high %v219_v18, %v219_v18 }
 0x14f   :  { %1119 = vrot.lane.b32.xlu1 %v214_v17, %s4101_s20  ;;  %402 = vrot.lane.b32.xlu0 %v214_v17, %s4102_s21  ;;  %v231_v25 = vrot.slane %v214_v17, %v4298_v24  ;;  %v224_v27 = vcombine.high %v214_v17, %v214_v17 }
 0x150   :  { %v288_v51 = vcombine.high %v280_v43, %v280_v43  ;;  %v296_v54 = vrot.slane %v280_v43, %v4298_v24  ;;  %v287_v58 = vrot.slane %v273_v50, %v4298_v24 }
 0x151   :  { %v239_v26 = vcombine.high %v231_v25, %v231_v25  ;;  %v247_v28 = vrot.slane %v231_v25, %v4298_v24  ;;  %v238_v31 = vrot.slane %v224_v27, %v4298_v24 }
 0x152   :  { %v310_v61 = vrot.slane %v288_v51, %v4298_v24  ;;  %v357_v62 = vrot.slane %v296_v54, %v4303_v29  ;;  %v318_v63 = vcombine.high %v296_v54, %v296_v54  ;;  %v289_v2 = vcombine.high %v287_v58, %v287_v58 }
 0x153   :  { %1121 = vrot.lane.b32.xlu1 %v219_v18, %s4101_s20  ;;  %404 = vrot.lane.b32.xlu0 %v219_v18, %s4102_s21  ;;  %v261_v30 = vrot.slane %v239_v26, %v4298_v24  ;;  %v269_v32 = vcombine.high %v247_v28, %v247_v28  ;;  %v325_v33 = vrot.slane %v247_v28, %v4303_v29  ;;  %v128_v26 = vld [vmem:[#allocation5] sm:$0xf] }
 0x154   :  { %v240_v35 = vcombine.high %v238_v31, %v238_v31  ;;  %v254_v41 = vrot.slane %v238_v31, %v4298_v24  ;;  %v361_v3 = vrot.slane %v310_v61, %v4303_v29  ;;  %v320_v4 = vcombine.high %v310_v61, %v310_v61  ;;  %3493 = vmatprep.subr.msk.mxu0 %vm970_vm1, %v128_v26 }
 0x155   :  { %v329_v34 = vrot.slane %v261_v30, %v4303_v29  ;;  %v271_v37 = vcombine.high %v261_v30, %v261_v30  ;;  %v333_v40 = vrot.slane %v269_v32, %v4303_v29  ;;  %v365_v5 = vrot.slane %v318_v63, %v4303_v29  ;;  %3494 = vmatpush3.msk.msra.mxu0 %vm970_vm1, %v128_v26 }
 0x156   :  { %v268_v45 = vrot.slane %v240_v35, %v4298_v24  ;;  %v341_v46 = vrot.slane %v254_v41, %v4303_v29  ;;  %v270_v47 = vcombine.high %v254_v41, %v254_v41  ;;  %v303_v6 = vrot.slane %v287_v58, %v4298_v24 }
 0x157   :  { %v337_v44 = vrot.slane %v271_v37, %v4303_v29  ;;  %v369_v9 = vrot.slane %v320_v4, %v4303_v29  ;;  %v317_v10 = vrot.slane %v289_v2, %v4298_v24 }
 0x158   :  { %v345_v52 = vrot.slane %v268_v45, %v4303_v29  ;;  %v272_v53 = vcombine.high %v268_v45, %v268_v45  ;;  %v349_v55 = vrot.slane %v270_v47, %v4303_v29  ;;  %v373_v12 = vrot.slane %v303_v6, %v4303_v29 }
 0x159   :  { %v319_v14 = vcombine.high %v303_v6, %v303_v6  ;;  %v377_v17 = vrot.slane %v317_v10, %v4303_v29  ;;  %v321_v18 = vcombine.high %v317_v10, %v317_v10 }
 0x15a   :  { %v353_v60 = vrot.slane %v272_v53, %v4303_v29 }
 0x15b   :  { %v381_v19 = vrot.slane %v319_v14, %v4303_v29  ;;  %v385_v22 = vrot.slane %v321_v18, %v4303_v29 }
 0x1c1   :  { %v403_v36 = vpop.permute.xlu0 %402 }
 0x1c2   :  { %v408_v38 = vmul.f32 %v403_v36, %v325_v33  ;;  %v409_v39 = vmul.f32 %v403_v36, %v329_v34  ;;  %v410_v42 = vmul.f32 %v403_v36, %v333_v40  ;;  %v411_v48 = vmul.f32 %v403_v36, %v337_v44 }
 0x1c3   :  { %v412_v49 = vmul.f32 %v403_v36, %v341_v46  ;;  %v413_v56 = vmul.f32 %v403_v36, %v345_v52  ;;  %v414_v57 = vmul.f32 %v403_v36, %v349_v55  ;;  %v415_v0 = vmul.f32 %v403_v36, %v353_v60 }
 0x1c4   :  { %3469 = vmatprep.mubr.msk.f32.mxu1 %vm140_vm0, %v408_v38 }
 0x1c5   :  { %3470 = vmatmul.mubr.msk.f32.vlgmr.msra.gmra.mrb[2].mxu1 %vm140_vm0, %v409_v39  ;;  %v405_v59 = vpop.permute.xlu0 %404 }
 0x1c6   :  { %3472 = vmatprep.mubr.msk.f32.mxu1 %vm140_vm0, %v410_v42  ;;  %v416_v1 = vmul.f32 %v405_v59, %v357_v62  ;;  %v417_v7 = vmul.f32 %v405_v59, %v361_v3  ;;  %v418_v8 = vmul.f32 %v405_v59, %v365_v5  ;;  %v419_v15 = vmul.f32 %v405_v59, %v369_v9 }
 0x1c7   :  { %v420_v16 = vmul.f32 %v405_v59, %v373_v12  ;;  %v421_v20 = vmul.f32 %v405_v59, %v377_v17  ;;  %v422_v21 = vmul.f32 %v405_v59, %v381_v19  ;;  %v423_v25 = vmul.f32 %v405_v59, %v385_v22 }
 0x1c9   :  { %3473 = vmatmul.mubr.msk.f32.gmra.mrb[4].mxu1 %vm140_vm0, %v411_v48 }
 0x1ca   :  { %3475 = vmatprep.mubr.msk.f32.mxu1 %vm140_vm0, %v412_v49 }
 0x1cd   :  { %3476 = vmatmul.mubr.msk.f32.gmra.mrb[6].mxu1 %vm140_vm0, %v413_v56 }
 0x1ce   :  { %3478 = vmatprep.mubr.msk.f32.mxu1 %vm140_vm0, %v414_v57 }
 0x1d1   :  { %3479 = vmatmul.mubr.msk.f32.gmra.mrb[8].mxu1 %vm140_vm0, %v415_v0 }
 0x1d2   :  { %3481 = vmatprep.mubr.msk.f32.mxu1 %vm140_vm0, %v416_v1 }
 0x1d5   :  { %3482 = vmatmul.mubr.msk.f32.gmra.mrb[10].mxu1 %vm140_vm0, %v417_v7 }
 0x1d6   :  { %3484 = vmatprep.mubr.msk.f32.mxu1 %vm140_vm0, %v418_v8 }
 0x1d9   :  { %3485 = vmatmul.mubr.msk.f32.gmra.mrb[12].mxu1 %vm140_vm0, %v419_v15 }
 0x1da   :  { %3487 = vmatprep.mubr.msk.f32.mxu1 %vm140_vm0, %v420_v16 }
 0x1dd   :  { %3488 = vmatmul.mubr.msk.f32.gmra.mrb[14].mxu1 %vm140_vm0, %v421_v20 }
 0x1de   :  { %3490 = vmatprep.mubr.msk.f32.mxu1 %vm140_vm0, %v422_v21 }
 0x1e1   :  { %3491 = vmatmul.mubr.msk.f32.gmra.mrb[16].mxu1 %vm140_vm0, %v423_v25 }
 0x298   :  { %v3471_v27 = vpop.f32.mrb[2].mxu1 }
 0x299   :  { %v625_v28 = vsel %vm617_vm2, %v3471_v27, -inf  ;;  %v538_v30 = vpop.f32.mrb[3].mxu1 }
 0x29a   :  { %v626_v31 = vrot.slane %v625_v28, 4  ;;  %v618_v32 = vsel %vm617_vm2, %v538_v30, -inf }
 0x29b   :  { %v619_v33 = vrot.slane %v618_v32, 4 }
 0x29c   :  { %v627_v34 = vmax.f32 %v625_v28, %v626_v31  ;;  %v3474_v35 = vpop.f32.mrb[4].mxu1 }
 0x29d   :  { %v620_v36 = vmax.f32 %v618_v32, %v619_v33  ;;  %v639_v37 = vsel %vm617_vm2, %v3474_v35, -inf  ;;  %v548_v38 = vpop.f32.mrb[5].mxu1 }
 0x29e   :  { %v628_v39 = vrot.slane %v627_v34, 2  ;;  %v640_v40 = vrot.slane %v639_v37, 4  ;;  %v632_v41 = vsel %vm617_vm2, %v548_v38, -inf }
 0x29f   :  { %v621_v42 = vrot.slane %v620_v36, 2  ;;  %v633_v43 = vrot.slane %v632_v41, 4 }
 0x2a0   :  { %v629_v44 = vmax.f32 %v627_v34, %v628_v39  ;;  %v641_v45 = vmax.f32 %v639_v37, %v640_v40  ;;  %v4353_v46 = vpop.f32.mrb[6].mxu1 }
 0x2a1   :  { %v622_v47 = vmax.f32 %v620_v36, %v621_v42  ;;  %v634_v48 = vmax.f32 %v632_v41, %v633_v43  ;;  %v653_v49 = vsel %vm617_vm2, %v4353_v46, -inf  ;;  %v4357_v50 = vpop.f32.mrb[7].mxu1 }
 0x2a2   :  { %v630_v51 = vrot.slane %v629_v44, 1  ;;  %v642_v52 = vrot.slane %v641_v45, 2  ;;  %v654_v53 = vrot.slane %v653_v49, 4  ;;  %v646_v54 = vsel %vm617_vm2, %v4357_v50, -inf }
 0x2a3   :  { %v623_v55 = vrot.slane %v622_v47, 1  ;;  %v635_v56 = vrot.slane %v634_v48, 2  ;;  %v647_v57 = vrot.slane %v646_v54, 4 }
 0x2a4   :  { %v631_v58 = vmax.f32 %v629_v44, %v630_v51  ;;  %v643_v59 = vmax.f32 %v641_v45, %v642_v52  ;;  %v655_v60 = vmax.f32 %v653_v49, %v654_v53  ;;  %v4361_v61 = vpop.f32.mrb[8].mxu1 }
 0x2a5   :  { %v624_v62 = vmax.f32 %v622_v47, %v623_v55  ;;  %v636_v63 = vmax.f32 %v634_v48, %v635_v56  ;;  %v648_v0 = vmax.f32 %v646_v54, %v647_v57  ;;  %v667_v1 = vsel %vm617_vm2, %v4361_v61, -inf  ;;  %v4365_v2 = vpop.f32.mrb[9].mxu1 }
 0x2a6   :  { %v731_v3 = vsub.f32 %v3471_v27, %v631_v58  ;;  %v644_v4 = vrot.slane %v643_v59, 1  ;;  %v656_v5 = vrot.slane %v655_v60, 2  ;;  %v668_v6 = vrot.slane %v667_v1, 4 }
 0x2a7   :  { %v730_v7 = vsub.f32 %v538_v30, %v624_v62  ;;  %v637_v8 = vrot.slane %v636_v63, 1  ;;  %v649_v9 = vrot.slane %v648_v0, 2  ;;  %v660_v10 = vsel %vm617_vm2, %v4365_v2, -inf }
 0x2a8   :  { %v748_v12 = vmul.f32 1.442695, %v731_v3  ;;  %v645_v14 = vmax.f32 %v643_v59, %v644_v4  ;;  %v657_v15 = vmax.f32 %v655_v60, %v656_v5  ;;  %v669_v16 = vmax.f32 %v667_v1, %v668_v6  ;;  %v4369_v17 = vpop.f32.mrb[10].mxu1 }
 0x2a9   :  { %v746_v18 = vmul.f32 1.442695, %v730_v7  ;;  %v638_v19 = vmax.f32 %v636_v63, %v637_v8  ;;  %v650_v20 = vmax.f32 %v648_v0, %v649_v9  ;;  %v661_v21 = vrot.slane %v660_v10, 4  ;;  %v4371_v22 = vpop.f32.mrb[11].mxu1 }
 0x2aa   :  { %3780 = vpow2.f32 %v748_v12  ;;  %v733_v25 = vsub.f32 %v3474_v35, %v645_v14  ;;  %v658_v26 = vrot.slane %v657_v15, 1  ;;  %v670_v27 = vrot.slane %v669_v16, 2 }
 0x2ab   :  { %3782 = vpow2.f32 %v746_v18  ;;  %v732_v28 = vsub.f32 %v548_v38, %v638_v19  ;;  %v651_v30 = vrot.slane %v650_v20, 1  ;;  %v662_v31 = vmax.f32 %v660_v10, %v661_v21 }
 0x2ac   :  { %v752_v32 = vmul.f32 1.442695, %v733_v25  ;;  %v659_v33 = vmax.f32 %v657_v15, %v658_v26  ;;  %v671_v34 = vmax.f32 %v669_v16, %v670_v27  ;;  %v681_v36 = vsel %vm617_vm2, %v4369_v17, -inf  ;;  %v4375_v37 = vpop.f32.mrb[12].mxu1 }
 0x2ad   :  { %v750_v39 = vmul.f32 1.442695, %v732_v28  ;;  %v652_v40 = vmax.f32 %v650_v20, %v651_v30  ;;  %v663_v41 = vrot.slane %v662_v31, 2  ;;  %v682_v42 = vrot.slane %v681_v36, 4  ;;  %v4377_v43 = vpop.f32.mrb[13].mxu1 }
 0x2ae   :  { %3784 = vpow2.f32 %v752_v32  ;;  %v735_v35 = vsub.f32 %v4353_v46, %v659_v33  ;;  %v672_v38 = vrot.slane %v671_v34, 1  ;;  %v674_v44 = vsel %vm617_vm2, %v4371_v22, -inf }
 0x2af   :  { %3786 = vpow2.f32 %v750_v39  ;;  %v734_v45 = vsub.f32 %v4357_v50, %v652_v40  ;;  %v664_v47 = vmax.f32 %v662_v31, %v663_v41  ;;  %v683_v48 = vmax.f32 %v681_v36, %v682_v42 }
 0x2b0   :  { %v756_v49 = vmul.f32 1.442695, %v735_v35  ;;  %v673_v51 = vmax.f32 %v671_v34, %v672_v38  ;;  %v675_v52 = vrot.slane %v674_v44, 4  ;;  %v695_v53 = vsel %vm617_vm2, %v4375_v37, -inf  ;;  %v4385_v54 = vpop.f32.mrb[14].mxu1 }
 0x2b1   :  { %v754_v55 = vmul.f32 1.442695, %v734_v45  ;;  %v665_v56 = vrot.slane %v664_v47, 1  ;;  %v684_v46 = vrot.slane %v683_v48, 2  ;;  %v696_v57 = vrot.slane %v695_v53, 4  ;;  %v4387_v58 = vpop.f32.mrb[15].mxu1 }
 0x2b2   :  { %3788 = vpow2.f32 %v756_v49  ;;  %v737_v59 = vsub.f32 %v4361_v61, %v673_v51  ;;  %v676_v50 = vmax.f32 %v674_v44, %v675_v52  ;;  %v688_v60 = vsel %vm617_vm2, %v4377_v43, -inf }
 0x2b3   :  { %3790 = vpow2.f32 %v754_v55  ;;  %v666_v62 = vmax.f32 %v664_v47, %v665_v56  ;;  %v685_v63 = vmax.f32 %v683_v48, %v684_v46  ;;  %v697_v0 = vmax.f32 %v695_v53, %v696_v57 }
 0x2b4   :  { %v4392_v1 = vpop.eup %3780  ;;  %v760_v3 = vmul.f32 1.442695, %v737_v59  ;;  %v677_v4 = vrot.slane %v676_v50, 2  ;;  %v689_v5 = vrot.slane %v688_v60, 4  ;;  %v4394_v6 = vpop.f32.mrb[16].mxu1  ;;  %v709_v34 = vsel %vm617_vm2, %v4385_v54, -inf }
 0x2b5   :  { %v4396_v7 = vpop.eup %3782  ;;  %v785_v61 = vsel %vm617_vm2, %v4392_v1, 0.0  ;;  %v736_v8 = vsub.f32 %v4365_v2, %v666_v62  ;;  %v686_v9 = vrot.slane %v685_v63, 1  ;;  %v698_v10 = vrot.slane %v697_v0, 2  ;;  %v4401_v12 = vpop.f32.mrb[17].mxu1 }
 0x2b6   :  { %v786_v14 = vrot.slane %v785_v61, 4  ;;  %3792 = vpow2.f32 %v760_v3  ;;  %v678_v15 = vmax.f32 %v676_v50, %v677_v4  ;;  %v778_v25 = vsel %vm617_vm2, %v4396_v7, 0.0 }
 0x2b7   :  { %v758_v16 = vmul.f32 1.442695, %v736_v8  ;;  %v687_v18 = vmax.f32 %v685_v63, %v686_v9  ;;  %v699_v19 = vmax.f32 %v697_v0, %v698_v10  ;;  %v690_v27 = vmax.f32 %v688_v60, %v689_v5 }
 0x2b8   :  { %v4403_v20 = vpop.eup %3784  ;;  %v787_v21 = vadd.f32 %v786_v14, %v785_v61  ;;  %v679_v26 = vrot.slane %v678_v15, 1  ;;  %v779_v36 = vrot.slane %v778_v25, 4  ;;  %v710_v55 = vrot.slane %v709_v34, 4 }
 0x2b9   :  { %v4407_v28 = vpop.eup %3786  ;;  %v799_v2 = vsel %vm617_vm2, %v4403_v20, 0.0  ;;  %3794 = vpow2.f32 %v758_v16  ;;  %v739_v30 = vsub.f32 %v4369_v17, %v687_v18  ;;  %v700_v41 = vrot.slane %v699_v19, 1 }
 0x2ba   :  { %v800_v31 = vrot.slane %v799_v2, 4  ;;  %v792_v32 = vsel %vm617_vm2, %v4407_v28, 0.0  ;;  %v680_v33 = vmax.f32 %v678_v15, %v679_v26  ;;  %v788_v35 = vrot.slane %v787_v21, 2 }
 0x2bb   :  { %v793_v39 = vrot.slane %v792_v32, 4  ;;  %v764_v40 = vmul.f32 1.442695, %v739_v30  ;;  %v691_v45 = vrot.slane %v690_v27, 2  ;;  %v701_v49 = vmax.f32 %v699_v19, %v700_v41 }
 0x2bc   :  { %v4416_v42 = vpop.eup %3788  ;;  %v801_v38 = vadd.f32 %v800_v31, %v799_v2  ;;  %v738_v44 = vsub.f32 %v4371_v22, %v680_v33  ;;  %v789_v50 = vadd.f32 %v788_v35, %v787_v21  ;;  %v780_v8 = vadd.f32 %v779_v36, %v778_v25 }
 0x2bd   :  { %v4419_v17 = vpop.eup %3790  ;;  %v794_v47 = vadd.f32 %v793_v39, %v792_v32  ;;  %v813_v48 = vsel %vm617_vm2, %v4416_v42, 0.0  ;;  %3796 = vpow2.f32 %v764_v40  ;;  %v741_v22 = vsub.f32 %v4375_v37, %v701_v49 }
 0x2be   :  { %v802_v51 = vrot.slane %v801_v38, 2  ;;  %v814_v52 = vrot.slane %v813_v48, 4  ;;  %v806_v53 = vsel %vm617_vm2, %v4419_v17, 0.0  ;;  %v762_v57 = vmul.f32 1.442695, %v738_v44 }
 0x2bf   :  { %v795_v56 = vrot.slane %v794_v47, 2  ;;  %v807_v46 = vrot.slane %v806_v53, 4  ;;  %v692_v62 = vmax.f32 %v690_v27, %v691_v45  ;;  %v768_v5 = vmul.f32 1.442695, %v741_v22 }
 0x2c0   :  { %v4426_v59 = vpop.eup %3792  ;;  %v815_v60 = vadd.f32 %v814_v52, %v813_v48  ;;  %v803_v63 = vadd.f32 %v802_v51, %v801_v38  ;;  %3798 = vpow2.f32 %v762_v57  ;;  %v711_v10 = vmax.f32 %v709_v34, %v710_v55 }
 0x2c1   :  { %v808_v0 = vadd.f32 %v807_v46, %v806_v53  ;;  %v796_v3 = vadd.f32 %v795_v56, %v794_v47  ;;  %v827_v4 = vsel %vm617_vm2, %v4426_v59, 0.0  ;;  %v693_v9 = vrot.slane %v692_v62, 1 }
 0x2c2   :  { %v790_v14 = vrot.slane %v789_v50, 1  ;;  %v816_v37 = vrot.slane %v815_v60, 2  ;;  %v804_v16 = vrot.slane %v803_v63, 1  ;;  %v828_v19 = vrot.slane %v827_v4, 4 }
 0x2c3   :  { %v4430_v61 = vpop.eup %3794  ;;  %v809_v18 = vrot.slane %v808_v0, 2  ;;  %3800 = vpow2.f32 %v768_v5  ;;  %v797_v21 = vrot.slane %v796_v3, 1  ;;  %v694_v26 = vmax.f32 %v692_v62, %v693_v9 }
 0x2c4   :  { %v820_v15 = vsel %vm617_vm2, %v4430_v61, 0.0  ;;  %v712_v27 = vrot.slane %v711_v10, 2  ;;  %v781_v30 = vrot.slane %v780_v8, 2  ;;  %v702_v25 = vsel %vm617_vm2, %v4387_v58, -inf }
 0x2c5   :  { %v821_v31 = vrot.slane %v820_v15, 4  ;;  %v723_v32 = vsel %vm617_vm2, %v4394_v6, -inf  ;;  %v791_v33 = vadd.f32 %v790_v14, %v789_v50  ;;  %v4440_v34 = vadd.f32 %v816_v37, %v815_v60 }
 0x2c6   :  { %v740_v39 = vsub.f32 %v4377_v43, %v694_v26  ;;  %v4445_v40 = vadd.f32 %v804_v16, %v803_v63  ;;  %v810_v41 = vadd.f32 %v809_v18, %v808_v0  ;;  %v829_v35 = vadd.f32 %v828_v19, %v827_v4 }
 0x2c7   :  { %v4434_v2 = vpop.eup %3796  ;;  %v713_v38 = vmax.f32 %v711_v10, %v712_v27  ;;  %v798_v44 = vadd.f32 %v797_v21, %v796_v3  ;;  %v703_v47 = vrot.slane %v702_v25, 4  ;;  %v724_v48 = vrot.slane %v723_v32, 4 }
 0x2c8   :  { %v841_v36 = vsel %vm617_vm2, %v4434_v2, 0.0  ;;  %v766_v45 = vmul.f32 1.442695, %v740_v39  ;;  %v822_v51 = vadd.f32 %v821_v31, %v820_v15  ;;  %v716_v55 = vsel %vm617_vm2, %v4401_v12, -inf }
 0x2c9   :  { %v842_v52 = vrot.slane %v841_v36, 4  ;;  %v714_v53 = vrot.slane %v713_v38, 1  ;;  %v818_v56 = vrot.slane %v4440_v34, 1  ;;  %v704_v46 = vmax.f32 %v702_v25, %v703_v47 }
 0x2ca   :  { %v4447_v49 = vpop.eup %3798  ;;  %3802 = vpow2.f32 %v766_v45  ;;  %v811_v57 = vrot.slane %v810_v41, 1  ;;  %v830_v22 = vrot.slane %v829_v35, 2  ;;  %v725_v63 = vmax.f32 %v723_v32, %v724_v48 }
 0x2cb   :  { %v834_v43 = vsel %vm617_vm2, %v4447_v49, 0.0  ;;  %v715_v60 = vmax.f32 %v713_v38, %v714_v53  ;;  %v705_v62 = vrot.slane %v704_v46, 2  ;;  %v717_v0 = vrot.slane %v716_v55, 4 }
 0x2cc   :  { %v835_v50 = vrot.slane %v834_v43, 4  ;;  %v782_v3 = vadd.f32 %v781_v30, %v780_v8  ;;  %v823_v5 = vrot.slane %v822_v51, 2  ;;  %v843_v9 = vadd.f32 %v842_v52, %v841_v36 }
 0x2cd   :  { %v4454_v4 = vpop.eup %3800  ;;  %v743_v14 = vsub.f32 %v4385_v54, %v715_v60  ;;  %v706_v15 = vmax.f32 %v704_v46, %v705_v62  ;;  %v726_v16 = vrot.slane %v725_v63, 2  ;;  %v718_v18 = vmax.f32 %v716_v55, %v717_v0 }
 0x2ce   :  { %v836_v10 = vadd.f32 %v835_v50, %v834_v43  ;;  %v855_v37 = vsel %vm617_vm2, %v4454_v4, 0.0  ;;  %v831_v19 = vadd.f32 %v830_v22, %v829_v35  ;;  %v783_v30 = vrot.slane %v782_v3, 1 }
 0x2cf   :  { %v856_v26 = vrot.slane %v855_v37, 4  ;;  %v772_v27 = vmul.f32 1.442695, %v743_v14  ;;  %v707_v31 = vrot.slane %v706_v15, 1  ;;  %v727_v25 = vmax.f32 %v725_v63, %v726_v16 }
 0x2d0   :  { %v837_v21 = vrot.slane %v836_v10, 2  ;;  %v719_v8 = vrot.slane %v718_v18, 2  ;;  %v812_v32 = vadd.f32 %v811_v57, %v810_v41  ;;  %v824_v39 = vadd.f32 %v823_v5, %v822_v51 }
 0x2d1   :  { %v844_v36 = vrot.slane %v843_v9, 2  ;;  %3804 = vpow2.f32 %v772_v27  ;;  %v708_v38 = vmax.f32 %v706_v15, %v707_v31  ;;  %v728_v54 = vrot.slane %v727_v25, 1 }
 0x2d2   :  { %v720_v45 = vmax.f32 %v718_v18, %v719_v8  ;;  %v784_v47 = vadd.f32 %v783_v30, %v782_v3  ;;  %v832_v48 = vrot.slane %v831_v19, 1  ;;  %v838_v52 = vadd.f32 %v837_v21, %v836_v10 }
 0x2d3   :  { %v857_v53 = vadd.f32 %v856_v26, %v855_v37  ;;  %3806 = vrcp.f32 %v791_v33  ;;  %v742_v55 = vsub.f32 %v4387_v58, %v708_v38  ;;  %v729_v43 = vmax.f32 %v727_v25, %v728_v54 }
 0x2d4   :  { %v4459_v35 = vpop.eup %3802  ;;  %v721_v46 = vrot.slane %v720_v45, 1  ;;  %3808 = vrcp.f32 %v784_v47  ;;  %v825_v22 = vrot.slane %v824_v39, 1  ;;  %v845_v41 = vadd.f32 %v844_v36, %v843_v9 }
 0x2d5   :  { %v848_v51 = vsel %vm617_vm2, %v4459_v35, 0.0  ;;  %3810 = vrcp.f32 %v798_v44  ;;  %v770_v50 = vmul.f32 1.442695, %v742_v55  ;;  %v745_v60 = vsub.f32 %v4394_v6, %v729_v43 }
 0x2d6   :  { %v849_v57 = vrot.slane %v848_v51, 4  ;;  %v722_v62 = vmax.f32 %v720_v45, %v721_v46  ;;  %v819_v33 = vadd.f32 %v818_v56, %v4440_v34  ;;  %v839_v63 = vrot.slane %v838_v52, 1 }
 0x2d7   :  { %v858_v0 = vrot.slane %v857_v53, 2  ;;  %3812 = vrcp.f32 %v4445_v40  ;;  %v776_v3 = vmul.f32 1.442695, %v745_v60  ;;  %v833_v9 = vadd.f32 %v832_v48, %v831_v19 }
 0x2d8   :  { %v850_v58 = vadd.f32 %v849_v57, %v848_v51  ;;  %3814 = vpow2.f32 %v770_v50  ;;  %v744_v5 = vsub.f32 %v4401_v12, %v722_v62  ;;  %v826_v10 = vadd.f32 %v825_v22, %v824_v39 }
 0x2d9   :  { %3816 = vrcp.f32 %v812_v32  ;;  %v846_v44 = vrot.slane %v845_v41, 1  ;;  %v840_v15 = vadd.f32 %v839_v63, %v838_v52  ;;  %v859_v34 = vadd.f32 %v858_v0, %v857_v53 }
 0x2da   :  { %v851_v14 = vrot.slane %v850_v58, 2  ;;  %3818 = vpow2.f32 %v776_v3  ;;  %v774_v37 = vmul.f32 1.442695, %v744_v5 }
 0x2db   :  { %v4468_v6 = vpop.eup %3804  ;;  %3820 = vrcp.f32 %v819_v33  ;;  %v847_v19 = vadd.f32 %v846_v44, %v845_v41  ;;  %v860_v27 = vrot.slane %v859_v34, 1 }
 0x2dc   :  { %v852_v56 = vadd.f32 %v851_v14, %v850_v58  ;;  %v869_v40 = vsel %vm617_vm2, %v4468_v6, 0.0  ;;  %3822 = vpow2.f32 %v774_v37 }
 0x2dd   :  { %v3807_v16 = vpop.eup %3806  ;;  %v870_v18 = vrot.slane %v869_v40, 4  ;;  %3824 = vrcp.f32 %v826_v10  ;;  %v861_v45 = vadd.f32 %v860_v27, %v859_v34 }
 0x2de   :  { %v3809_v12 = vpop.eup %3808  ;;  %v853_v21 = vrot.slane %v852_v56, 1  ;;  %3826 = vrcp.f32 %v833_v9  ;;  %v893_v30 = vmul.f32 %v3807_v16, %v4392_v1 }
 0x2df   :  { %v3811_v26 = vpop.eup %3810  ;;  %v871_v31 = vadd.f32 %v870_v18, %v869_v40  ;;  %v891_v25 = vmul.f32 %v3809_v12, %v4396_v7  ;;  %3828 = vrcp.f32 %v840_v15 }
 0x2e0   :  { %v854_v8 = vadd.f32 %v853_v21, %v852_v56  ;;  %v895_v32 = vmul.f32 %v3811_v26, %v4407_v28 }
 0x2e1   :  { %v3813_v39 = vpop.eup %3812  ;;  %v872_v36 = vrot.slane %v871_v31, 2  ;;  %3495 = vmatprep.mubr.msk.f32.mxu0 %vm617_vm2, %v891_v25 }
 0x2e2   :  { %v4476_v38 = vpop.eup %3814  ;;  %3496 = vmatmul.mubr.msk.f32.vlgmr.msra.gmra.mrb[0].mxu0 %vm617_vm2, %v893_v30  ;;  %3830 = vrcp.f32 %v854_v8  ;;  %v897_v48 = vmul.f32 %v3813_v39, %v4403_v20  ;;  %v1256_v39 = vld [vmem:[%s4997_s5 + $0x18] sm:$0xff] }
 0x2e3   :  { %v3817_v54 = vpop.eup %3816  ;;  %v873_v47 = vadd.f32 %v872_v36, %v871_v31  ;;  %v862_v7 = vsel %vm617_vm2, %v4476_v38, 0.0  ;;  %3498 = vmatprep.mubr.msk.f32.mxu0 %vm617_vm2, %v895_v32  ;;  %3832 = vrcp.f32 %v847_v19  ;;  %v1255_v32 = vld [vmem:[%s4997_s5 + $0x10] sm:$0xff] }
 0x2e4   :  { %v4482_v1 = vpop.eup %3818  ;;  %v863_v28 = vrot.slane %v862_v7, 4  ;;  %v899_v52 = vmul.f32 %v3817_v54, %v4419_v17  ;;  %3834 = vrcp.f32 %v861_v45  ;;  %v3690_v36 = vpack.c.bf16 %v1256_v39, %v1255_v32 }
 0x2e5   :  { %v3821_v53 = vpop.eup %3820  ;;  %v883_v55 = vsel %vm617_vm2, %v4482_v1, 0.0  ;;  %v874_v51 = vrot.slane %v873_v47, 1 }
 0x2e6   :  { %v3823_v43 = vpop.eup %3822  ;;  %v864_v46 = vadd.f32 %v863_v28, %v862_v7  ;;  %v884_v22 = vrot.slane %v883_v55, 4  ;;  %3499 = vmatmul.mubr.msk.f32.gmra.mrb[2].mxu0 %vm617_vm2, %v897_v48  ;;  %v901_v50 = vmul.f32 %v3821_v53, %v4416_v42 }
 0x2e7   :  { %v3825_v41 = vpop.eup %3824  ;;  %v876_v57 = vsel %vm617_vm2, %v3823_v43, 0.0  ;;  %3501 = vmatprep.mubr.msk.f32.mxu0 %vm617_vm2, %v899_v52  ;;  %v875_v5 = vadd.f32 %v874_v51, %v873_v47 }
 0x2e8   :  { %v3827_v20 = vpop.eup %3826  ;;  %v865_v17 = vrot.slane %v864_v46, 2  ;;  %v885_v60 = vadd.f32 %v884_v22, %v883_v55  ;;  %v877_v62 = vrot.slane %v876_v57, 4  ;;  %v903_v33 = vmul.f32 %v3825_v41, %v4430_v61 }
 0x2e9   :  { %v3829_v63 = vpop.eup %3828  ;;  %v905_v37 = vmul.f32 %v3827_v20, %v4426_v59  ;;  %3836 = vrcp.f32 %v875_v5 }
 0x2ea   :  { %v866_v0 = vadd.f32 %v865_v17, %v864_v46  ;;  %v886_v58 = vrot.slane %v885_v60, 2  ;;  %v878_v3 = vadd.f32 %v877_v62, %v876_v57  ;;  %3502 = vmatmul.mubr.msk.f32.gmra.mrb[4].mxu0 %vm617_vm2, %v901_v50  ;;  %v907_v9 = vmul.f32 %v3829_v63, %v4447_v49 }
 0x2eb   :  { %3504 = vmatprep.mubr.msk.f32.mxu0 %vm617_vm2, %v903_v33 }
 0x2ec   :  { %v3831_v10 = vpop.eup %3830  ;;  %v867_v42 = vrot.slane %v866_v0, 1  ;;  %v887_v44 = vadd.f32 %v886_v58, %v885_v60  ;;  %v879_v14 = vrot.slane %v878_v3, 2 }
 0x2ed   :  { %v3833_v15 = vpop.eup %3832  ;;  %v911_v40 = vmul.f32 %v3831_v10, %v4459_v35 }
 0x2ee   :  { %v868_v34 = vadd.f32 %v867_v42, %v866_v0  ;;  %v888_v61 = vrot.slane %v887_v44, 1  ;;  %v880_v56 = vadd.f32 %v879_v14, %v878_v3  ;;  %3505 = vmatmul.mubr.msk.f32.gmra.mrb[6].mxu0 %vm617_vm2, %v905_v37  ;;  %v909_v49 = vmul.f32 %v3833_v15, %v4434_v2  ;;  %v3835_v12 = vpop.eup %3834 }
 0x2ef   :  { %3507 = vmatprep.mubr.msk.f32.mxu0 %vm617_vm2, %v907_v9  ;;  %v913_v59 = vmul.f32 %v3835_v12, %v4454_v4  ;;  %v1253_v4 = vld [vmem:[%s4997_s5] sm:$0xff] }
 0x2f0   :  { %v889_v16 = vadd.f32 %v888_v61, %v887_v44  ;;  %v881_v18 = vrot.slane %v880_v56, 1  ;;  %3838 = vrcp.f32 %v868_v34 }
 0x2f2   :  { %v882_v19 = vadd.f32 %v881_v18, %v880_v56  ;;  %3508 = vmatmul.mubr.msk.f32.gmra.mrb[8].mxu0 %vm617_vm2, %v909_v49  ;;  %3840 = vrcp.f32 %v889_v16 }
 0x2f3   :  { %3510 = vmatprep.mubr.msk.f32.mxu0 %vm617_vm2, %v911_v40  ;;  %v3837_v21 = vpop.eup %3836 }
 0x2f4   :  { %3842 = vrcp.f32 %v882_v19  ;;  %v917_v27 = vmul.f32 %v3837_v21, %v4468_v6  ;;  %v1254_v6 = vld [vmem:[%s4997_s5 + $0x8] sm:$0xff] }
 0x2f5   :  { %v3686_v30 = vpack.c.bf16 %v1254_v6, %v1253_v4 }
 0x2f6   :  { %3511 = vmatmul.mubr.msk.f32.gmra.mrb[10].mxu0 %vm617_vm2, %v913_v59 }
 0x2f7   :  { %3687 = vmatprep.subr.bf16.mxu1 %v3686_v30 }
 0x2f8   :  { %3689 = vmatpush3.bf16.msra.mxu1 %v3686_v30 }
 0x2f9   :  { %3691 = vmatprep.subr.bf16.mxu1 %v3690_v36 }
 0x2fa   :  { %v3839_v35 = vpop.eup %3838 }
 0x2fb   :  { %v915_v26 = vmul.f32 %v3839_v35, %v4476_v38  ;;  %v1120_v38 = vpop.permute.xlu1 %1119 }
 0x2fc   :  { %v3841_v2 = vpop.eup %3840  ;;  %3693 = vmatpush3.bf16.msra.mxu1 %v3690_v36 }
 0x2fd   :  { %3513 = vmatprep.mubr.msk.f32.mxu0 %vm617_vm2, %v915_v26  ;;  %v921_v8 = vmul.f32 %v3841_v2, %v4482_v1 }
 0x2fe   :  { %v3843_v31 = vpop.eup %3842  ;;  %3514 = vmatmul.mubr.msk.f32.gmra.mrb[12].mxu0 %vm617_vm2, %v917_v27 }
 0x2ff   :  { %v919_v25 = vmul.f32 %v3843_v31, %v3823_v43  ;;  %v4532_v4 = vpop.permute.xlu1 %1121 }
 0x301   :  { %3516 = vmatprep.mubr.msk.f32.mxu0 %vm617_vm2, %v919_v25 }
 0x302   :  { %3517 = vmatmul.mubr.msk.f32.gmra.mrb[14].mxu0 %vm617_vm2, %v921_v8 }
 0x3b5   :  { %v3497_v54 = vpop.f32.mrb[0].mxu0 }
 0x3b6   :  { %v1126_v45 = vmul.f32 %v3497_v54, %v1120_v38  ;;  %v1040_v47 = vpop.f32.mrb[1].mxu0 }
 0x3b7   :  { %v1125_v7 = vmul.f32 %v1120_v38, %v1040_v47 }
 0x3b8   :  { %v1148_v1 = vsel %vm140_vm0, %v1126_v45, 0.0 }
 0x3b9   :  { %v1149_v28 = vrot.slane %v1148_v1, 4  ;;  %v1141_v48 = vsel %vm140_vm0, %v1125_v7, 0.0  ;;  %v3500_v52 = vpop.f32.mrb[2].mxu0 }
 0x3ba   :  { %v1142_v53 = vrot.slane %v1141_v48, 4  ;;  %v1128_v55 = vmul.f32 %v3500_v52, %v1120_v38  ;;  %v1050_v43 = vpop.f32.mrb[3].mxu0 }
 0x3bb   :  { %v1150_v46 = vadd.f32 %v1149_v28, %v1148_v1  ;;  %v1127_v22 = vmul.f32 %v1120_v38, %v1050_v43 }
 0x3bc   :  { %v1143_v41 = vadd.f32 %v1142_v53, %v1141_v48  ;;  %v1162_v51 = vsel %vm140_vm0, %v1128_v55, 0.0 }
 0x3bd   :  { %v1151_v57 = vrot.slane %v1150_v46, 2  ;;  %v1163_v50 = vrot.slane %v1162_v51, 4  ;;  %v1155_v20 = vsel %vm140_vm0, %v1127_v22, 0.0  ;;  %v3503_v17 = vpop.f32.mrb[4].mxu0 }
 0x3be   :  { %v1144_v60 = vrot.slane %v1143_v41, 2  ;;  %v1156_v62 = vrot.slane %v1155_v20, 4  ;;  %v1130_v33 = vmul.f32 %v3503_v17, %v1120_v38  ;;  %v1060_v63 = vpop.f32.mrb[5].mxu0 }
 0x3bf   :  { %v1152_v0 = vadd.f32 %v1151_v57, %v1150_v46  ;;  %v1164_v58 = vadd.f32 %v1163_v50, %v1162_v51  ;;  %v1129_v3 = vmul.f32 %v1120_v38, %v1060_v63 }
 0x3c0   :  { %v1145_v5 = vadd.f32 %v1144_v60, %v1143_v41  ;;  %v1157_v9 = vadd.f32 %v1156_v62, %v1155_v20  ;;  %v1176_v10 = vsel %vm140_vm0, %v1130_v33, 0.0 }
 0x3c1   :  { %v1153_v42 = vrot.slane %v1152_v0, 1  ;;  %v1165_v44 = vrot.slane %v1164_v58, 2  ;;  %v1177_v14 = vrot.slane %v1176_v10, 4  ;;  %v1169_v37 = vsel %vm140_vm0, %v1129_v3, 0.0  ;;  %v3506_v15 = vpop.f32.mrb[6].mxu0 }
 0x3c2   :  { %v1146_v34 = vrot.slane %v1145_v5, 1  ;;  %v1158_v61 = vrot.slane %v1157_v9, 2  ;;  %v1170_v56 = vrot.slane %v1169_v37, 4  ;;  %v1132_v40 = vmul.f32 %v3506_v15, %v1120_v38  ;;  %v1070_v16 = vpop.f32.mrb[7].mxu0 }
 0x3c3   :  { %v1154_v18 = vadd.f32 %v1153_v42, %v1152_v0  ;;  %v1166_v49 = vadd.f32 %v1165_v44, %v1164_v58  ;;  %v1178_v12 = vadd.f32 %v1177_v14, %v1176_v10  ;;  %v1131_v19 = vmul.f32 %v1120_v38, %v1070_v16 }
 0x3c4   :  { %v1147_v59 = vadd.f32 %v1146_v34, %v1145_v5  ;;  %v1159_v21 = vadd.f32 %v1158_v61, %v1157_v9  ;;  %v1171_v35 = vadd.f32 %v1170_v56, %v1169_v37  ;;  %v1190_v26 = vsel %vm140_vm0, %v1132_v40, 0.0 }
 0x3c5   :  { %v1167_v27 = vrot.slane %v1166_v49, 1  ;;  %v1179_v2 = vrot.slane %v1178_v12, 2  ;;  %v1191_v31 = vrot.slane %v1190_v26, 4  ;;  %v1183_v25 = vsel %vm140_vm0, %v1131_v19, 0.0  ;;  %v3509_v8 = vpop.f32.mrb[8].mxu0 }
 0x3c6   :  { %v1281_v6 = vsel %vm1280_vm3, %v1154_v18, %v1147_v59  ;;  %v1160_v30 = vrot.slane %v1159_v21, 1  ;;  %v1172_v32 = vrot.slane %v1171_v35, 2  ;;  %v1184_v39 = vrot.slane %v1183_v25, 4  ;;  %v1080_v36 = vpop.f32.mrb[9].mxu0 }
 0x3c7   :  { %v1180_v38 = vadd.f32 %v1179_v2, %v1178_v12  ;;  %v1192_v54 = vadd.f32 %v1191_v31, %v1190_v26  ;;  %v1134_v45 = vmul.f32 %v3509_v8, %v4532_v4  ;;  %v1133_v28 = vmul.f32 %v4532_v4, %v1080_v36 }
 0x3c8   :  { %v1161_v47 = vadd.f32 %v1160_v30, %v1159_v21  ;;  %v1173_v7 = vadd.f32 %v1172_v32, %v1171_v35  ;;  %v1185_v1 = vadd.f32 %v1184_v39, %v1183_v25  ;;  %v1168_v48 = vadd.f32 %v1167_v27, %v1166_v49 }
 0x3c9   :  { %v1193_v52 = vrot.slane %v1192_v54, 2  ;;  %v1204_v53 = vsel %vm140_vm0, %v1134_v45, 0.0  ;;  %v3512_v55 = vpop.f32.mrb[10].mxu0  ;;  %v1181_v57 = vrot.slane %v1180_v38, 1  ;;  %v1197_v20 = vsel %vm140_vm0, %v1133_v28, 0.0 }
 0x3ca   :  { %v1283_v43 = vsel %vm1282_vm4, %v1161_v47, %v1281_v6  ;;  %v1174_v46 = vrot.slane %v1173_v7, 1  ;;  %v1186_v22 = vrot.slane %v1185_v1, 2  ;;  %v1205_v41 = vrot.slane %v1204_v53, 4  ;;  %v1090_v51 = vpop.f32.mrb[11].mxu0 }
 0x3cb   :  { %v1194_v50 = vadd.f32 %v1193_v52, %v1192_v54  ;;  %v1136_v17 = vmul.f32 %v3512_v55, %v4532_v4  ;;  %v1198_v63 = vrot.slane %v1197_v20, 4  ;;  %v1135_v58 = vmul.f32 %v4532_v4, %v1090_v51 }
 0x3cc   :  { %v1175_v60 = vadd.f32 %v1174_v46, %v1173_v7  ;;  %v1187_v62 = vadd.f32 %v1186_v22, %v1185_v1  ;;  %v1206_v33 = vadd.f32 %v1205_v41, %v1204_v53  ;;  %v1285_v3 = vsel %vm1284_vm5, %v1168_v48, %v1283_v43 }
 0x3cd   :  { %v1218_v0 = vsel %vm140_vm0, %v1136_v17, 0.0  ;;  %v1199_v10 = vadd.f32 %v1198_v63, %v1197_v20  ;;  %v1182_v44 = vadd.f32 %v1181_v57, %v1180_v38  ;;  %v1195_v14 = vrot.slane %v1194_v50, 1 }
 0x3ce   :  { %v1188_v5 = vrot.slane %v1187_v62, 1  ;;  %v1207_v9 = vrot.slane %v1206_v33, 2  ;;  %v1219_v42 = vrot.slane %v1218_v0, 4  ;;  %v1211_v37 = vsel %vm140_vm0, %v1135_v58, 0.0 }
 0x3cf   :  { %v1287_v15 = vsel %vm1286_vm6, %v1175_v60, %v1285_v3  ;;  %v1200_v56 = vrot.slane %v1199_v10, 2  ;;  %v1212_v16 = vrot.slane %v1211_v37, 4  ;;  %v1196_v26 = vadd.f32 %v1195_v14, %v1194_v50 }
 0x3d0   :  { %v1189_v34 = vadd.f32 %v1188_v5, %v1187_v62  ;;  %v1208_v61 = vadd.f32 %v1207_v9, %v1206_v33  ;;  %v1220_v40 = vadd.f32 %v1219_v42, %v1218_v0  ;;  %v1289_v49 = vsel %vm1288_vm7, %v1182_v44, %v1287_v15 }
 0x3d1   :  { %v3515_v18 = vpop.f32.mrb[12].mxu0  ;;  %v1201_v19 = vadd.f32 %v1200_v56, %v1199_v10  ;;  %v1213_v27 = vadd.f32 %v1212_v16, %v1211_v37 }
 0x3d2   :  { %v1209_v12 = vrot.slane %v1208_v61, 1  ;;  %v1221_v59 = vrot.slane %v1220_v40, 2  ;;  %v1138_v21 = vmul.f32 %v3515_v18, %v4532_v4  ;;  %v1100_v35 = vpop.f32.mrb[13].mxu0  ;;  %v1291_v31 = vsel %vm1290_vm8, %v1189_v34, %v1289_v49 }
 0x3d3   :  { %v1137_v2 = vmul.f32 %v4532_v4, %v1100_v35  ;;  %v1202_v8 = vrot.slane %v1201_v19, 1  ;;  %v1214_v32 = vrot.slane %v1213_v27, 2  ;;  %v1293_v54 = vsel %vm1292_vm9, %v1196_v26, %v1291_v31  ;;  %v3924_v31 = vld [vmem:[#allocation2 + $0x8] sm:$0xff] }
 0x3d4   :  { %v1210_v25 = vadd.f32 %v1209_v12, %v1208_v61  ;;  %v1222_v6 = vadd.f32 %v1221_v59, %v1220_v40  ;;  %v1232_v30 = vsel %vm140_vm0, %v1138_v21, 0.0  ;;  %3527 = vmatprep.mubr.msk.f32.mxu1 %vm140_vm0, %v1293_v54  ;;  %v1426_v12 = vld [vmem:[%s4999_s7] sm:$0xff]  ;;  %v3245_v21 = vld [vmem:[#allocation8] ss:$0 sm:$0xff] }
 0x3d5   :  { %v1233_v39 = vrot.slane %v1232_v30, 4  ;;  %v1225_v36 = vsel %vm140_vm0, %v1137_v2, 0.0  ;;  %v3518_v38 = vpop.f32.mrb[14].mxu0  ;;  %v1203_v45 = vadd.f32 %v1202_v8, %v1201_v19  ;;  %v1215_v28 = vadd.f32 %v1214_v32, %v1213_v27  ;;  %v1427_v19 = vld [vmem:[%s4999_s7 + $0x8] sm:$0xff]  ;;  %v3925_v8 = vld [vmem:[#allocation2] sm:$0xff] }
 0x3d6   :  { %v1226_v47 = vrot.slane %v1225_v36, 4  ;;  %v1140_v7 = vmul.f32 %v3518_v38, %v4532_v4  ;;  %v1110_v1 = vpop.f32.mrb[15].mxu0  ;;  %v1223_v55 = vrot.slane %v1222_v6, 1  ;;  %v3694_v59 = vpack.c.bf16 %v1427_v19, %v1426_v12  ;;  %v1527_v12 = vld [vmem:[%s5001_s9 + $0x38] sm:$0xff] }
 0x3d7   :  { %v1234_v48 = vadd.f32 %v1233_v39, %v1232_v30  ;;  %v1139_v52 = vmul.f32 %v4532_v4, %v1110_v1  ;;  %v1294_v53 = vsel %vm1280_vm3, %v1210_v25, %v1203_v45  ;;  %v1216_v22 = vrot.slane %v1215_v28, 1  ;;  %v1428_v45 = vld [vmem:[%s4999_s7 + $0x10] sm:$0xff]  ;;  %v1520_v1 = vld [vmem:[%s5001_s9] sm:$0xff] }
 0x3d8   :  { %v1227_v43 = vadd.f32 %v1226_v47, %v1225_v36  ;;  %v1246_v46 = vsel %vm140_vm0, %v1140_v7, 0.0  ;;  %v1224_v33 = vadd.f32 %v1223_v55, %v1222_v6  ;;  %3695 = vmatprep.subr.bf16.mxu0 %v3694_v59  ;;  %v1429_v47 = vld [vmem:[%s4999_s7 + $0x18] sm:$0xff] }
 0x3d9   :  { %v1235_v41 = vrot.slane %v1234_v48, 2  ;;  %v1247_v51 = vrot.slane %v1246_v46, 4  ;;  %v1239_v57 = vsel %vm140_vm0, %v1139_v52, 0.0  ;;  %v1217_v17 = vadd.f32 %v1216_v22, %v1215_v28  ;;  %3697 = vmatpush3.bf16.msra.mxu0 %v3694_v59  ;;  %v1521_v28 = vld [vmem:[%s5001_s9 + $0x8] sm:$0xff]  ;;  %v3926_v59 = vld [vmem:[#allocation5] sm:$0xf] }
 0x3da   :  { %v1228_v50 = vrot.slane %v1227_v43, 2  ;;  %v1240_v20 = vrot.slane %v1239_v57, 4  ;;  %v3698_v7 = vpack.c.bf16 %v1429_v47, %v1428_v45  ;;  %v3702_v52 = vpack.c.bf16 %v1521_v28, %v1520_v1 }
 0x3db   :  { %v1236_v60 = vadd.f32 %v1235_v41, %v1234_v48  ;;  %v1248_v62 = vadd.f32 %v1247_v51, %v1246_v46  ;;  %v1295_v4 = vsel %vm1282_vm4, %v1217_v17, %v1294_v53  ;;  %v1522_v48 = vld [vmem:[%s5001_s9 + $0x10] sm:$0xff]  ;;  %v1523_v53 = vld [vmem:[%s5001_s9 + $0x18] sm:$0xff]  ;;  %v1525_v46 = vld [vmem:[%s5001_s9 + $0x28] sm:$0xff] }
 0x3dc   :  { %v1229_v63 = vadd.f32 %v1228_v50, %v1227_v43  ;;  %v1241_v0 = vadd.f32 %v1240_v20, %v1239_v57  ;;  %v1296_v9 = vsel %vm1284_vm5, %v1224_v33, %v1295_v4  ;;  %3699 = vmatprep.subr.bf16.mxu0 %v3698_v7  ;;  %v3706_v55 = vpack.c.bf16 %v1523_v53, %v1522_v48  ;;  %v1524_v43 = vld [vmem:[%s5001_s9 + $0x20] sm:$0xff] }
 0x3dd   :  { %v1237_v58 = vrot.slane %v1236_v60, 1  ;;  %v1249_v3 = vrot.slane %v1248_v62, 2  ;;  %3701 = vmatpush3.bf16.msra.mxu0 %v3698_v7  ;;  %3703 = vmatprep.subr.bf16.mxu1 %v3702_v52  ;;  %v3710_v22 = vpack.c.bf16 %v1525_v46, %v1524_v43  ;;  %v3254_v48 = vld [vmem:[%s4995_s3 + $0x20] sm:$0xff]  ;;  %v3257_v43 = vld [vmem:[%s4995_s3 + $0x38] sm:$0xff] }
 0x3de   :  { %v1230_v5 = vrot.slane %v1229_v63, 1  ;;  %v1242_v10 = vrot.slane %v1241_v0, 2 }
 0x3df   :  { %v1250_v42 = vadd.f32 %v1249_v3, %v1248_v62  ;;  %v1238_v37 = vadd.f32 %v1237_v58, %v1236_v60 }
 0x3e0   :  { %v1231_v44 = vadd.f32 %v1230_v5, %v1229_v63  ;;  %v1243_v14 = vadd.f32 %v1242_v10, %v1241_v0  ;;  %v4603_v5 = vld [vmem:[%s5003_s11] sm:$0xf] }
 0x3e1   :  { %v1251_v15 = vrot.slane %v1250_v42, 1 }
 0x3e2   :  { %v1297_v34 = vsel %vm1286_vm6, %v1231_v44, %v1296_v9  ;;  %v1244_v61 = vrot.slane %v1243_v14, 1  ;;  %v1422_v9 = vsub.s32 1, %v4295_v23 }
 0x3e3   :  { %v1298_v56 = vsel %vm1288_vm7, %v1238_v37, %v1297_v34  ;;  %v1252_v16 = vadd.f32 %v1251_v15, %v1250_v42  ;;  %v1417_v42 = vrot.slane %v4603_v5, %v4303_v29 }
 0x3e4   :  { %v1245_v40 = vadd.f32 %v1244_v61, %v1243_v14  ;;  %v1423_v37 = vrot.slane %v4603_v5, %v1422_v9 }
 0x3e6   :  { %v1299_v18 = vsel %vm1290_vm8, %v1245_v40, %v1298_v56 }
 0x3e7   :  { %v1300_v49 = vsel %vm1292_vm9, %v1252_v16, %v1299_v18 }
 0x3e8   :  { %3528 = vmatmul.mubr.msk.f32.vlgmr.msra.gmra.mrb[18].mxu1 %vm140_vm0, %v1300_v49  ;;  %v1526_v49 = vld [vmem:[%s5001_s9 + $0x30] sm:$0xff] }
 0x3e9   :  { %3705 = vmatpush3.bf16.msra.mxu1 %v3702_v52  ;;  %v3714_v19 = vpack.c.bf16 %v1527_v12, %v1526_v49  ;;  %v3255_v52 = vld [vmem:[%s4995_s3 + $0x28] sm:$0xff]  ;;  %v3258_v12 = vld [vmem:[#allocation7 + $0x1] ss:$0 sm:$0xff] }
 0x3ea   :  { %3707 = vmatprep.subr.bf16.mxu1 %v3706_v55  ;;  %v3718_v53 = vpack.c.bf16 %v3255_v52, %v3254_v48 }
 0x3ec   :  { %3719 = vmatprep.subr.bf16.mxu0 %v3718_v53 }
 0x3ed   :  { %3709 = vmatpush3.bf16.msra.mxu1 %v3706_v55  ;;  %v3256_v55 = vld [vmem:[%s4995_s3 + $0x30] sm:$0xff] }
 0x3ee   :  { %3711 = vmatprep.subr.bf16.mxu1 %v3710_v22  ;;  %v3722_v46 = vpack.c.bf16 %v3257_v43, %v3256_v55 }
 0x3f1   :  { %3713 = vmatpush3.bf16.msra.mxu1 %v3710_v22 }
 0x3f2   :  { %3715 = vmatprep.subr.bf16.mxu1 %v3714_v19 }
 0x3f5   :  { %3717 = vmatpush3.bf16.msra.mxu1 %v3714_v19 }
 0x3f6   :  { %3603 = vmatprep.subr.msk.mxu1 %vm970_vm1, %v3926_v59 }
 0x4bb   :  { %v3529_v35 = vpop.f32.mrb[18].mxu1 }
 0x4bc   :  { %v1377_v26 = vadd.f32 %v3529_v35, %v3245_v21  ;;  %v1371_v27 = vpop.f32.mrb[19].mxu1 }
 0x4bd   :  { %v1372_v2 = vadd.f32 %v3245_v21, %v1371_v27  ;;  %v3248_v21 = vld [vmem:[#allocation10] ss:$0 sm:$0xff] }
 0x4be   :  { %v1382_v25 = vadd.f32 %v3924_v31, %v1377_v26 }
 0x4bf   :  { %v1381_v6 = vadd.f32 %v3925_v8, %v1372_v2  ;;  %v3251_v8 = vld [vmem:[#allocation11] ss:$0 sm:$0xff] }
 0x4c0   :  { %v1386_v30 = vsel %vm140_vm0, %v1382_v25, 0.0  ;;  %v1393_v38 = vmul.f32 %v1382_v25, %v1382_v25 }
 0x4c1   :  { %1387 = vadd.xlane.f32.xlu1 %v1386_v30  ;;  %v1383_v32 = vsel %vm140_vm0, %v1381_v6, 0.0  ;;  %v1392_v39 = vmul.f32 %v1381_v6, %v1381_v6 }
 0x4c2   :  { %1384 = vadd.xlane.f32.xlu0 %v1383_v32  ;;  %v1397_v54 = vsel %vm140_vm0, %v1393_v38, 0.0 }
 0x4c3   :  { %v1394_v36 = vsel %vm140_vm0, %v1392_v39, 0.0 }
 0x4c6   :  { %1395 = vadd.xlane.f32.xlu0 %v1394_v36 }
 0x4ca   :  { %1398 = vadd.xlane.f32.xlu0 %v1397_v54 }
 0x54e   :  { %v1388_v57 = vpop.xlane.xlu1 %1387 }
 0x54f   :  { %v1385_v41 = vpop.xlane.xlu0 %1384  ;;  %v1391_v20 = vmul.f32 0.03125, %v1388_v57 }
 0x550   :  { %v1390_v51 = vmul.f32 0.03125, %v1385_v41 }
 0x551   :  { %v1403_v63 = vmul.f32 %v1391_v20, %v1391_v20  ;;  %v1407_v15 = vsub.f32 %v1382_v25, %v1391_v20 }
 0x552   :  { %v1402_v17 = vmul.f32 %v1390_v51, %v1390_v51  ;;  %v1406_v10 = vsub.f32 %v1381_v6, %v1390_v51 }
 0x553   :  { %v1396_v50 = vpop.xlane.xlu0 %1395 }
 0x554   :  { %v1400_v60 = vmul.f32 0.03125, %v1396_v50 }
 0x556   :  { %v1404_v62 = vsub.f32 %v1400_v60, %v1402_v17 }
 0x557   :  { %v1399_v33 = vpop.xlane.xlu0 %1398 }
 0x558   :  { %v1408_v0 = vadd.f32 1e-05, %v1404_v62  ;;  %v1401_v4 = vmul.f32 0.03125, %v1399_v33 }
 0x55a   :  { %3844 = vrsqrt.f32 %v1408_v0  ;;  %v1405_v58 = vsub.f32 %v1401_v4, %v1403_v63 }
 0x55c   :  { %v1409_v3 = vadd.f32 1e-05, %v1405_v58 }
 0x55e   :  { %3846 = vrsqrt.f32 %v1409_v3  ;;  %v1651_v3 = vsub.s32 2, %v4295_v23 }
 0x564   :  { %v3845_v44 = vpop.eup %3844 }
 0x565   :  { %v1412_v14 = vmul.f32 %v3845_v44, %v1406_v10  ;;  %v1657_v10 = vsub.s32 3, %v4295_v23  ;;  %v1652_v44 = vrot.slane %v4603_v5, %v1651_v3 }
 0x567   :  { %v1418_v34 = vmul.f32 %v1417_v42, %v1412_v14 }
 0x568   :  { %v3847_v61 = vpop.eup %3846 }
 0x569   :  { %v1413_v56 = vmul.f32 %v3847_v61, %v1407_v15  ;;  %v1424_v40 = vadd.f32 %v1423_v37, %v1418_v34 }
 0x56b   :  { %v1419_v16 = vmul.f32 %v1417_v42, %v1413_v56  ;;  %3538 = vmatprep.mubr.msk.f32.mxu0 %vm140_vm0, %v1424_v40  ;;  %v1658_v56 = vrot.slane %v4603_v5, %v1657_v10 }
 0x56d   :  { %v1425_v18 = vadd.f32 %v1423_v37, %v1419_v16 }
 0x56f   :  { %3539 = vmatmul.mubr.msk.f32.vlgmr.msra.gmra.mrb[16].mxu0 %vm140_vm0, %v1425_v18 }
 0x570   :  { %3721 = vmatpush3.bf16.msra.mxu0 %v3718_v53 }
 0x571   :  { %3723 = vmatprep.subr.bf16.mxu0 %v3722_v46 }
 0x574   :  { %3725 = vmatpush3.bf16.msra.mxu0 %v3722_v46 }
 0x575   :  { %3727 = vmatprep.subr.bf16.mxu0 %v4280_v11 }
 0x642   :  { %v3540_v35 = vpop.f32.mrb[16].mxu0 }
 0x643   :  { %v1515_v26 = vadd.f32 %v3540_v35, %v3248_v21  ;;  %v1509_v27 = vpop.f32.mrb[17].mxu0 }
 0x644   :  { %v1510_v2 = vadd.f32 %v3248_v21, %v1509_v27 }
 0x645   :  { %v1519_v25 = vmax.f32 %v1515_v26, 0.0 }
 0x646   :  { %v1518_v31 = vmax.f32 %v1510_v2, 0.0 }
 0x648   :  { %3557 = vmatprep.mubr.msk.f32.mxu1 %vm1535_vm10, %v1518_v31 }
 0x649   :  { %3558 = vmatmul.mubr.msk.f32.vlgmr.msra.gmra.mrb[20].mxu1 %vm1535_vm10, %v1519_v25 }
 0x64a   :  { %3604 = vmatpush3.msk.msra.mxu1 %vm970_vm1, %v3926_v59 }
 0x71c   :  { %v3559_v6 = vpop.f32.mrb[20].mxu1 }
 0x71d   :  { %v1614_v30 = vadd.f32 %v3559_v6, %v3251_v8  ;;  %v1608_v32 = vpop.f32.mrb[21].mxu1 }
 0x71e   :  { %v1609_v39 = vadd.f32 %v3251_v8, %v1608_v32 }
 0x71f   :  { %v1618_v36 = vadd.f32 %v1614_v30, %v1425_v18 }
 0x720   :  { %v1617_v38 = vadd.f32 %v1609_v39, %v1424_v40 }
 0x721   :  { %v1622_v54 = vsel %vm140_vm0, %v1618_v36, 0.0  ;;  %v1628_v45 = vmul.f32 %v1618_v36, %v1618_v36 }
 0x722   :  { %1623 = vadd.xlane.f32.xlu0 %v1622_v54  ;;  %v1619_v47 = vsel %vm140_vm0, %v1617_v38, 0.0  ;;  %v1627_v7 = vmul.f32 %v1617_v38, %v1617_v38 }
 0x723   :  { %1620 = vadd.xlane.f32.xlu1 %v1619_v47  ;;  %v1632_v1 = vsel %vm140_vm0, %v1628_v45, 0.0 }
 0x724   :  { %v1629_v28 = vsel %vm140_vm0, %v1627_v7, 0.0 }
 0x726   :  { %1633 = vadd.xlane.f32.xlu0 %v1632_v1 }
 0x727   :  { %1630 = vadd.xlane.f32.xlu1 %v1629_v28 }
 0x7af   :  { %v1624_v22 = vpop.xlane.xlu0 %1623 }
 0x7b0   :  { %v1626_v41 = vmul.f32 0.03125, %v1624_v22  ;;  %v1621_v51 = vpop.xlane.xlu1 %1620 }
 0x7b1   :  { %v1625_v57 = vmul.f32 0.03125, %v1621_v51 }
 0x7b2   :  { %v1638_v20 = vmul.f32 %v1626_v41, %v1626_v41  ;;  %v1642_v42 = vsub.f32 %v1618_v36, %v1626_v41 }
 0x7b3   :  { %v1634_v50 = vpop.xlane.xlu0 %1633  ;;  %v1637_v62 = vmul.f32 %v1625_v57, %v1625_v57  ;;  %v1641_v37 = vsub.f32 %v1617_v38, %v1625_v57 }
 0x7b4   :  { %v1636_v17 = vmul.f32 0.03125, %v1634_v50  ;;  %v1631_v60 = vpop.xlane.xlu1 %1630 }
 0x7b5   :  { %v1635_v33 = vmul.f32 0.03125, %v1631_v60 }
 0x7b6   :  { %v1640_v63 = vsub.f32 %v1636_v17, %v1638_v20 }
 0x7b7   :  { %v1639_v0 = vsub.f32 %v1635_v33, %v1637_v62 }
 0x7b8   :  { %v1644_v4 = vadd.f32 1e-05, %v1640_v63 }
 0x7b9   :  { %v1643_v58 = vadd.f32 1e-05, %v1639_v0 }
 0x7ba   :  { %3848 = vrsqrt.f32 %v1644_v4 }
 0x7bb   :  { %3850 = vrsqrt.f32 %v1643_v58 }
 0x7c4   :  { %v3849_v14 = vpop.eup %3848 }
 0x7c5   :  { %v3851_v15 = vpop.eup %3850  ;;  %v1648_v34 = vmul.f32 %v3849_v14, %v1642_v42 }
 0x7c6   :  { %v1647_v61 = vmul.f32 %v3851_v15, %v1641_v37 }
 0x7c7   :  { %v1654_v40 = vmul.f32 %v1652_v44, %v1648_v34 }
 0x7c8   :  { %v1653_v16 = vmul.f32 %v1652_v44, %v1647_v61 }
 0x7c9   :  { %v4650_v49 = vadd.f32 %v1658_v56, %v1654_v40 }
 0x7ca   :  { %v4648_v18 = vadd.f32 %v1658_v56, %v1653_v16 }
 0x7cc   :  { %3568 = vmatprep.mubr.msk.f32.mxu0 %vm140_vm0, %v4648_v18 }
 0x7cd   :  { %3569 = vmatmul.mubr.msk.f32.vlgmr.msra.gmra.mrb[18].mxu0 %vm140_vm0, %v4650_v49 }
 0x7ce   :  { %3729 = vmatpush3.bf16.msra.mxu0 %v4280_v11 }
 0x7cf   :  { %3731 = vmatprep.subr.bf16.mxu0 %v4285_v13 }
 0x7d2   :  { %3733 = vmatpush3.bf16.msra.mxu0 %v4285_v13 }
 0x8a0   :  { %v3570_v5 = vpop.f32.mrb[18].mxu0 }
 0x8a1   :  { %v1752_v19 = vadd.f32 %v3570_v5, %v3258_v12  ;;  %v1746_v59 = vpop.f32.mrb[19].mxu0 }
 0x8a2   :  { %v1747_v21 = vadd.f32 %v3258_v12, %v1746_v59 }
 0x8a3   :  { %1937 = vrot.lane.b32.xlu0 %v1752_v19, %s4102_s21  ;;  %v1813_v47 = vrot.slane %v1752_v19, %v4298_v24  ;;  %v1806_v55 = vcombine.high %v1752_v19, %v1752_v19 }
 0x8a4   :  { %1935 = vrot.lane.b32.xlu1 %v1747_v21, %s4102_s21  ;;  %v1764_v35 = vrot.slane %v1747_v21, %v4298_v24  ;;  %v1757_v26 = vcombine.high %v1747_v21, %v1747_v21 }
 0x8a5   :  { %v1821_v43 = vcombine.high %v1813_v47, %v1813_v47  ;;  %v1829_v41 = vrot.slane %v1813_v47, %v4298_v24  ;;  %v1820_v20 = vrot.slane %v1806_v55, %v4298_v24 }
 0x8a6   :  { %v1772_v11 = vcombine.high %v1764_v35, %v1764_v35  ;;  %v1780_v27 = vrot.slane %v1764_v35, %v4298_v24  ;;  %v1771_v2 = vrot.slane %v1757_v26, %v4298_v24 }
 0x8a7   :  { %v1843_v62 = vrot.slane %v1821_v43, %v4298_v24  ;;  %v1890_v33 = vrot.slane %v1829_v41, %v4303_v29  ;;  %v1851_v63 = vcombine.high %v1829_v41, %v1829_v41  ;;  %v1822_v58 = vcombine.high %v1820_v20, %v1820_v20 }
 0x8a8   :  { %2647 = vrot.lane.b32.xlu1 %v1747_v21, %s4101_s20  ;;  %v1794_v13 = vrot.slane %v1772_v11, %v4298_v24  ;;  %v1802_v31 = vcombine.high %v1780_v27, %v1780_v27  ;;  %v1858_v25 = vrot.slane %v1780_v27, %v4303_v29  ;;  %v1773_v6 = vcombine.high %v1771_v2, %v1771_v2 }
 0x8a9   :  { %v1787_v54 = vrot.slane %v1771_v2, %v4298_v24  ;;  %v1894_v42 = vrot.slane %v1843_v62, %v4303_v29  ;;  %v1853_v44 = vcombine.high %v1843_v62, %v1843_v62  ;;  %v1898_v14 = vrot.slane %v1851_v63, %v4303_v29 }
 0x8aa   :  { %v1862_v8 = vrot.slane %v1794_v13, %v4303_v29  ;;  %v1804_v32 = vcombine.high %v1794_v13, %v1794_v13  ;;  %v1866_v38 = vrot.slane %v1802_v31, %v4303_v29  ;;  %v1801_v1 = vrot.slane %v1773_v6, %v4298_v24 }
 0x8ab   :  { %v1874_v28 = vrot.slane %v1787_v54, %v4303_v29  ;;  %v1803_v48 = vcombine.high %v1787_v54, %v1787_v54  ;;  %v1836_v37 = vrot.slane %v1820_v20, %v4298_v24  ;;  %v1902_v61 = vrot.slane %v1853_v44, %v4303_v29 }
 0x8ac   :  { %2649 = vrot.lane.b32.xlu1 %v1752_v19, %s4101_s20  ;;  %v1870_v7 = vrot.slane %v1804_v32, %v4303_v29  ;;  %v1878_v46 = vrot.slane %v1801_v1, %v4303_v29  ;;  %v1805_v22 = vcombine.high %v1801_v1, %v1801_v1  ;;  %v1850_v56 = vrot.slane %v1822_v58, %v4298_v24 }
 0x8ad   :  { %v1882_v51 = vrot.slane %v1803_v48, %v4303_v29  ;;  %v1906_v40 = vrot.slane %v1836_v37, %v4303_v29  ;;  %v1852_v16 = vcombine.high %v1836_v37, %v1836_v37 }
 0x8ae   :  { %v1886_v60 = vrot.slane %v1805_v22, %v4303_v29  ;;  %v1910_v19 = vrot.slane %v1850_v56, %v4303_v29  ;;  %v1854_v59 = vcombine.high %v1850_v56, %v1850_v56 }
 0x8af   :  { %v1914_v21 = vrot.slane %v1852_v16, %v4303_v29 }
 0x8b0   :  { %v1918_v24 = vrot.slane %v1854_v59, %v4303_v29 }
 0x915   :  { %v1938_v17 = vpop.permute.xlu0 %1937 }
 0x916   :  { %v1936_v30 = vpop.permute.xlu1 %1935  ;;  %v1949_v4 = vmul.f32 %v1938_v17, %v1890_v33  ;;  %v1950_v15 = vmul.f32 %v1938_v17, %v1894_v42  ;;  %v1951_v34 = vmul.f32 %v1938_v17, %v1898_v14  ;;  %v1952_v12 = vmul.f32 %v1938_v17, %v1902_v61 }
 0x917   :  { %v1941_v39 = vmul.f32 %v1936_v30, %v1858_v25  ;;  %v1942_v36 = vmul.f32 %v1936_v30, %v1862_v8  ;;  %v1943_v45 = vmul.f32 %v1936_v30, %v1866_v38  ;;  %v1944_v52 = vmul.f32 %v1936_v30, %v1870_v7 }
 0x918   :  { %v1945_v53 = vmul.f32 %v1936_v30, %v1874_v28  ;;  %v1946_v57 = vmul.f32 %v1936_v30, %v1878_v46  ;;  %v1947_v50 = vmul.f32 %v1936_v30, %v1882_v51  ;;  %v1948_v0 = vmul.f32 %v1936_v30, %v1886_v60 }
 0x919   :  { %3579 = vmatprep.mubr.msk.f32.mxu0 %vm140_vm0, %v1941_v39  ;;  %v1953_v5 = vmul.f32 %v1938_v17, %v1906_v40  ;;  %v1954_v35 = vmul.f32 %v1938_v17, %v1910_v19  ;;  %v1955_v11 = vmul.f32 %v1938_v17, %v1914_v21  ;;  %v1956_v26 = vmul.f32 %v1938_v17, %v1918_v24 }
 0x91a   :  { %3580 = vmatmul.mubr.msk.f32.vlgmr.msra.gmra.mrb[20].mxu0 %vm140_vm0, %v1942_v36 }
 0x91b   :  { %3582 = vmatprep.mubr.msk.f32.mxu0 %vm140_vm0, %v1943_v45 }
 0x91e   :  { %3583 = vmatmul.mubr.msk.f32.gmra.mrb[22].mxu0 %vm140_vm0, %v1944_v52 }
 0x91f   :  { %3585 = vmatprep.mubr.msk.f32.mxu0 %vm140_vm0, %v1945_v53 }
 0x922   :  { %3586 = vmatmul.mubr.msk.f32.gmra.mrb[24].mxu0 %vm140_vm0, %v1946_v57 }
 0x923   :  { %3588 = vmatprep.mubr.msk.f32.mxu0 %vm140_vm0, %v1947_v50 }
 0x926   :  { %3589 = vmatmul.mubr.msk.f32.gmra.mrb[26].mxu0 %vm140_vm0, %v1948_v0 }
 0x927   :  { %3591 = vmatprep.mubr.msk.f32.mxu0 %vm140_vm0, %v1949_v4 }
 0x92a   :  { %3592 = vmatmul.mubr.msk.f32.gmra.mrb[28].mxu0 %vm140_vm0, %v1950_v15 }
 0x92b   :  { %3594 = vmatprep.mubr.msk.f32.mxu0 %vm140_vm0, %v1951_v34 }
 0x92e   :  { %3595 = vmatmul.mubr.msk.f32.gmra.mrb[30].mxu0 %vm140_vm0, %v1952_v12 }
 0x92f   :  { %3597 = vmatprep.mubr.msk.f32.mxu0 %vm140_vm0, %v1953_v5 }
 0x932   :  { %3598 = vmatmul.mubr.msk.f32.gmra.mrb[32].mxu0 %vm140_vm0, %v1954_v35 }
 0x933   :  { %3600 = vmatprep.mubr.msk.f32.mxu0 %vm140_vm0, %v1955_v11 }
 0x936   :  { %3601 = vmatmul.mubr.msk.f32.gmra.mrb[34].mxu0 %vm140_vm0, %v1956_v26 }
 0x9ed   :  { %v3581_v27 = vpop.f32.mrb[20].mxu0 }
 0x9ee   :  { %v2157_v13 = vsel %vm617_vm2, %v3581_v27, -inf  ;;  %v2071_v2 = vpop.f32.mrb[21].mxu0 }
 0x9ef   :  { %v2158_v31 = vrot.slane %v2157_v13, 4  ;;  %v2150_v25 = vsel %vm617_vm2, %v2071_v2, -inf }
 0x9f0   :  { %v2151_v8 = vrot.slane %v2150_v25, 4 }
 0x9f1   :  { %v2159_v6 = vmax.f32 %v2157_v13, %v2158_v31  ;;  %v3584_v30 = vpop.f32.mrb[22].mxu0 }
 0x9f2   :  { %v2152_v32 = vmax.f32 %v2150_v25, %v2151_v8  ;;  %v2171_v39 = vsel %vm617_vm2, %v3584_v30, -inf  ;;  %v2081_v36 = vpop.f32.mrb[23].mxu0 }
 0x9f3   :  { %v2160_v38 = vrot.slane %v2159_v6, 2  ;;  %v2172_v54 = vrot.slane %v2171_v39, 4  ;;  %v2164_v45 = vsel %vm617_vm2, %v2081_v36, -inf }
 0x9f4   :  { %v2153_v47 = vrot.slane %v2152_v32, 2  ;;  %v2165_v7 = vrot.slane %v2164_v45, 4 }
 0x9f5   :  { %v2161_v1 = vmax.f32 %v2159_v6, %v2160_v38  ;;  %v2173_v28 = vmax.f32 %v2171_v39, %v2172_v54  ;;  %v4711_v48 = vpop.f32.mrb[24].mxu0 }
 0x9f6   :  { %v2154_v52 = vmax.f32 %v2152_v32, %v2153_v47  ;;  %v2166_v53 = vmax.f32 %v2164_v45, %v2165_v7  ;;  %v2185_v55 = vsel %vm617_vm2, %v4711_v48, -inf  ;;  %v4715_v43 = vpop.f32.mrb[25].mxu0 }
 0x9f7   :  { %v2162_v46 = vrot.slane %v2161_v1, 1  ;;  %v2174_v22 = vrot.slane %v2173_v28, 2  ;;  %v2186_v41 = vrot.slane %v2185_v55, 4  ;;  %v2178_v51 = vsel %vm617_vm2, %v4715_v43, -inf }
 0x9f8   :  { %v2155_v57 = vrot.slane %v2154_v52, 1  ;;  %v2167_v50 = vrot.slane %v2166_v53, 2  ;;  %v2179_v20 = vrot.slane %v2178_v51, 4 }
 0x9f9   :  { %v2163_v17 = vmax.f32 %v2161_v1, %v2162_v46  ;;  %v2175_v60 = vmax.f32 %v2173_v28, %v2174_v22  ;;  %v2187_v62 = vmax.f32 %v2185_v55, %v2186_v41  ;;  %v4719_v33 = vpop.f32.mrb[26].mxu0 }
 0x9fa   :  { %v2156_v63 = vmax.f32 %v2154_v52, %v2155_v57  ;;  %v2168_v0 = vmax.f32 %v2166_v53, %v2167_v50  ;;  %v2180_v4 = vmax.f32 %v2178_v51, %v2179_v20  ;;  %v2199_v58 = vsel %vm617_vm2, %v4719_v33, -inf  ;;  %v4723_v42 = vpop.f32.mrb[27].mxu0 }
 0x9fb   :  { %v2263_v44 = vsub.f32 %v3581_v27, %v2163_v17  ;;  %v2176_v14 = vrot.slane %v2175_v60, 1  ;;  %v2188_v37 = vrot.slane %v2187_v62, 2  ;;  %v2200_v15 = vrot.slane %v2199_v58, 4 }
 0x9fc   :  { %v2262_v34 = vsub.f32 %v2071_v2, %v2156_v63  ;;  %v2169_v61 = vrot.slane %v2168_v0, 1  ;;  %v2181_v56 = vrot.slane %v2180_v4, 2  ;;  %v2192_v40 = vsel %vm617_vm2, %v4723_v42, -inf }
 0x9fd   :  { %v2280_v16 = vmul.f32 1.442695, %v2263_v44  ;;  %v2177_v12 = vmax.f32 %v2175_v60, %v2176_v14  ;;  %v2189_v5 = vmax.f32 %v2187_v62, %v2188_v37  ;;  %v2201_v19 = vmax.f32 %v2199_v58, %v2200_v15  ;;  %v4727_v59 = vpop.f32.mrb[28].mxu0 }
 0x9fe   :  { %v2278_v21 = vmul.f32 1.442695, %v2262_v34  ;;  %v2170_v35 = vmax.f32 %v2168_v0, %v2169_v61  ;;  %v2182_v11 = vmax.f32 %v2180_v4, %v2181_v56  ;;  %v2193_v24 = vrot.slane %v2192_v40, 4  ;;  %v4729_v26 = vpop.f32.mrb[29].mxu0 }
 0x9ff   :  { %3852 = vpow2.f32 %v2280_v16  ;;  %v2265_v27 = vsub.f32 %v3584_v30, %v2177_v12  ;;  %v2190_v13 = vrot.slane %v2189_v5, 1  ;;  %v2202_v2 = vrot.slane %v2201_v19, 2 }
 0xa00   :  { %3854 = vpow2.f32 %v2278_v21  ;;  %v2264_v31 = vsub.f32 %v2081_v36, %v2170_v35  ;;  %v2183_v25 = vrot.slane %v2182_v11, 1  ;;  %v2194_v8 = vmax.f32 %v2192_v40, %v2193_v24 }
 0xa01   :  { %v2284_v6 = vmul.f32 1.442695, %v2265_v27  ;;  %v2191_v32 = vmax.f32 %v2189_v5, %v2190_v13  ;;  %v2203_v39 = vmax.f32 %v2201_v19, %v2202_v2  ;;  %v2213_v38 = vsel %vm617_vm2, %v4727_v59, -inf  ;;  %v4733_v54 = vpop.f32.mrb[30].mxu0 }
 0xa02   :  { %v2282_v45 = vmul.f32 1.442695, %v2264_v31  ;;  %v2184_v47 = vmax.f32 %v2182_v11, %v2183_v25  ;;  %v2195_v7 = vrot.slane %v2194_v8, 2  ;;  %v2214_v1 = vrot.slane %v2213_v38, 4  ;;  %v4735_v28 = vpop.f32.mrb[31].mxu0 }
 0xa03   :  { %3856 = vpow2.f32 %v2284_v6  ;;  %v2267_v30 = vsub.f32 %v4711_v48, %v2191_v32  ;;  %v2204_v36 = vrot.slane %v2203_v39, 1  ;;  %v2206_v52 = vsel %vm617_vm2, %v4729_v26, -inf }
 0xa04   :  { %3858 = vpow2.f32 %v2282_v45  ;;  %v2266_v53 = vsub.f32 %v4715_v43, %v2184_v47  ;;  %v2196_v55 = vmax.f32 %v2194_v8, %v2195_v7  ;;  %v2215_v46 = vmax.f32 %v2213_v38, %v2214_v1 }
 0xa05   :  { %v2288_v22 = vmul.f32 1.442695, %v2267_v30  ;;  %v2205_v41 = vmax.f32 %v2203_v39, %v2204_v36  ;;  %v2207_v51 = vrot.slane %v2206_v52, 4  ;;  %v2227_v57 = vsel %vm617_vm2, %v4733_v54, -inf  ;;  %v4743_v50 = vpop.f32.mrb[32].mxu0 }
 0xa06   :  { %v2286_v20 = vmul.f32 1.442695, %v2266_v53  ;;  %v2197_v17 = vrot.slane %v2196_v55, 1  ;;  %v2216_v48 = vrot.slane %v2215_v46, 2  ;;  %v2228_v60 = vrot.slane %v2227_v57, 4  ;;  %v4745_v62 = vpop.f32.mrb[33].mxu0 }
 0xa07   :  { %3860 = vpow2.f32 %v2288_v22  ;;  %v2269_v63 = vsub.f32 %v4719_v33, %v2205_v41  ;;  %v2208_v43 = vmax.f32 %v2206_v52, %v2207_v51  ;;  %v2220_v15 = vsel %vm617_vm2, %v4735_v28, -inf }
 0xa08   :  { %3862 = vpow2.f32 %v2286_v20  ;;  %v2198_v0 = vmax.f32 %v2196_v55, %v2197_v17  ;;  %v2217_v4 = vmax.f32 %v2215_v46, %v2216_v48  ;;  %v2229_v58 = vmax.f32 %v2227_v57, %v2228_v60 }
 0xa09   :  { %v4748_v44 = vpop.eup %3852  ;;  %v2292_v14 = vmul.f32 1.442695, %v2269_v63  ;;  %v2209_v37 = vrot.slane %v2208_v43, 2  ;;  %v4752_v34 = vpop.f32.mrb[34].mxu0  ;;  %v2221_v25 = vrot.slane %v2220_v15, 4  ;;  %v2241_v36 = vsel %vm617_vm2, %v4743_v50, -inf }
 0xa0a   :  { %v4754_v61 = vpop.eup %3854  ;;  %v2317_v56 = vsel %vm617_vm2, %v4748_v44, 0.0  ;;  %v2268_v33 = vsub.f32 %v4723_v42, %v2198_v0  ;;  %v2218_v40 = vrot.slane %v2217_v4, 1  ;;  %v2230_v16 = vrot.slane %v2229_v58, 2  ;;  %v4759_v12 = vpop.f32.mrb[35].mxu0 }
 0xa0b   :  { %v2318_v5 = vrot.slane %v2317_v56, 4  ;;  %v2310_v19 = vsel %vm617_vm2, %v4754_v61, 0.0  ;;  %3864 = vpow2.f32 %v2292_v14  ;;  %v2210_v21 = vmax.f32 %v2208_v43, %v2209_v37 }
 0xa0c   :  { %v2311_v35 = vrot.slane %v2310_v19, 4  ;;  %v2290_v11 = vmul.f32 1.442695, %v2268_v33  ;;  %v2219_v24 = vmax.f32 %v2217_v4, %v2218_v40  ;;  %v2231_v31 = vmax.f32 %v2229_v58, %v2230_v16 }
 0xa0d   :  { %v4763_v27 = vpop.eup %3856  ;;  %v2319_v13 = vadd.f32 %v2318_v5, %v2317_v56  ;;  %v2211_v2 = vrot.slane %v2210_v21, 1  ;;  %v2222_v57 = vmax.f32 %v2220_v15, %v2221_v25  ;;  %v2242_v37 = vrot.slane %v2241_v36, 4 }
 0xa0e   :  { %v4765_v42 = vpop.eup %3858  ;;  %v2312_v8 = vadd.f32 %v2311_v35, %v2310_v19  ;;  %v2331_v6 = vsel %vm617_vm2, %v4763_v27, 0.0  ;;  %3866 = vpow2.f32 %v2290_v11  ;;  %v2271_v32 = vsub.f32 %v4727_v59, %v2219_v24 }
 0xa0f   :  { %v2320_v39 = vrot.slane %v2319_v13, 2  ;;  %v2332_v38 = vrot.slane %v2331_v6, 4  ;;  %v2324_v45 = vsel %vm617_vm2, %v4765_v42, 0.0  ;;  %v2212_v47 = vmax.f32 %v2210_v21, %v2211_v2 }
 0xa10   :  { %v2313_v7 = vrot.slane %v2312_v8, 2  ;;  %v2325_v1 = vrot.slane %v2324_v45, 4  ;;  %v2296_v30 = vmul.f32 1.442695, %v2271_v32  ;;  %v2232_v22 = vrot.slane %v2231_v31, 1 }
 0xa11   :  { %v4774_v52 = vpop.eup %3860  ;;  %v2321_v53 = vadd.f32 %v2320_v39, %v2319_v13  ;;  %v2333_v55 = vadd.f32 %v2332_v38, %v2331_v6  ;;  %v2270_v46 = vsub.f32 %v4729_v26, %v2212_v47  ;;  %v2223_v40 = vrot.slane %v2222_v57, 2 }
 0xa12   :  { %v4777_v59 = vpop.eup %3862  ;;  %v2326_v41 = vadd.f32 %v2325_v1, %v2324_v45  ;;  %v2345_v51 = vsel %vm617_vm2, %v4774_v52, 0.0  ;;  %3868 = vpow2.f32 %v2296_v30  ;;  %v2314_v20 = vadd.f32 %v2313_v7, %v2312_v8 }
 0xa13   :  { %v2334_v17 = vrot.slane %v2333_v55, 2  ;;  %v2346_v48 = vrot.slane %v2345_v51, 4  ;;  %v2338_v60 = vsel %vm617_vm2, %v4777_v59, 0.0  ;;  %v2294_v0 = vmul.f32 1.442695, %v2270_v46 }
 0xa14   :  { %v2327_v63 = vrot.slane %v2326_v41, 2  ;;  %v2339_v43 = vrot.slane %v2338_v60, 4  ;;  %v2322_v26 = vrot.slane %v2321_v53, 1  ;;  %v2233_v14 = vmax.f32 %v2231_v31, %v2232_v22 }
 0xa15   :  { %v4783_v4 = vpop.eup %3864  ;;  %v2347_v58 = vadd.f32 %v2346_v48, %v2345_v51  ;;  %v2335_v56 = vadd.f32 %v2334_v17, %v2333_v55  ;;  %v2315_v16 = vrot.slane %v2314_v20, 1  ;;  %3870 = vpow2.f32 %v2294_v0 }
 0xa16   :  { %v2340_v33 = vadd.f32 %v2339_v43, %v2338_v60  ;;  %v2359_v15 = vsel %vm617_vm2, %v4783_v4, 0.0  ;;  %v2328_v5 = vadd.f32 %v2327_v63, %v2326_v41  ;;  %v2273_v24 = vsub.f32 %v4733_v54, %v2233_v14 }
 0xa17   :  { %v2348_v19 = vrot.slane %v2347_v58, 2  ;;  %v2360_v21 = vrot.slane %v2359_v15, 4  ;;  %v2323_v13 = vadd.f32 %v2322_v26, %v2321_v53  ;;  %v2336_v25 = vrot.slane %v2335_v56, 1 }
 0xa18   :  { %v4787_v35 = vpop.eup %3866  ;;  %v2341_v11 = vrot.slane %v2340_v33, 2  ;;  %v2300_v32 = vmul.f32 1.442695, %v2273_v24  ;;  %v2316_v39 = vadd.f32 %v2315_v16, %v2314_v20  ;;  %v2329_v38 = vrot.slane %v2328_v5, 1 }
 0xa19   :  { %v2349_v2 = vadd.f32 %v2348_v19, %v2347_v58  ;;  %v2352_v31 = vsel %vm617_vm2, %v4787_v35, 0.0  ;;  %v2361_v8 = vadd.f32 %v2360_v21, %v2359_v15  ;;  %v2224_v45 = vmax.f32 %v2222_v57, %v2223_v40 }
 0xa1a   :  { %v2353_v6 = vrot.slane %v2352_v31, 4  ;;  %v2243_v47 = vmax.f32 %v2241_v36, %v2242_v37  ;;  %v2342_v1 = vadd.f32 %v2341_v11, %v2340_v33  ;;  %3872 = vpow2.f32 %v2300_v32 }
 0xa1b   :  { %v2234_v54 = vsel %vm617_vm2, %v4745_v62, -inf  ;;  %3874 = vrcp.f32 %v2323_v13  ;;  %v2350_v53 = vrot.slane %v2349_v2, 1  ;;  %v2225_v46 = vrot.slane %v2224_v45, 1 }
 0xa1c   :  { %v4792_v7 = vpop.eup %3868  ;;  %v2354_v30 = vadd.f32 %v2353_v6, %v2352_v31  ;;  %v2337_v22 = vadd.f32 %v2336_v25, %v2335_v56  ;;  %v2362_v41 = vrot.slane %v2361_v8, 2  ;;  %v2244_v20 = vrot.slane %v2243_v47, 2 }
 0xa1d   :  { %v2373_v55 = vsel %vm617_vm2, %v4792_v7, 0.0  ;;  %v2330_v57 = vadd.f32 %v2329_v38, %v2328_v5  ;;  %v2226_v36 = vmax.f32 %v2224_v45, %v2225_v46  ;;  %v2235_v17 = vrot.slane %v2234_v54, 4 }
 0xa1e   :  { %v2374_v51 = vrot.slane %v2373_v55, 4  ;;  %v2255_v48 = vsel %vm617_vm2, %v4752_v34, -inf  ;;  %v2343_v60 = vrot.slane %v2342_v1, 1  ;;  %v2355_v63 = vrot.slane %v2354_v30, 2 }
 0xa1f   :  { %v2245_v43 = vmax.f32 %v2243_v47, %v2244_v20  ;;  %v2256_v0 = vrot.slane %v2255_v48, 4  ;;  %v2351_v26 = vadd.f32 %v2350_v53, %v2349_v2  ;;  %v2272_v58 = vsub.f32 %v4735_v28, %v2226_v36  ;;  %v4803_v56 = vpop.eup %3870 }
 0xa20   :  { %v2236_v14 = vmax.f32 %v2234_v54, %v2235_v17  ;;  %v2248_v37 = vsel %vm617_vm2, %v4759_v12, -inf  ;;  %v2363_v33 = vadd.f32 %v2362_v41, %v2361_v8  ;;  %v2375_v15 = vadd.f32 %v2374_v51, %v2373_v55 }
 0xa21   :  { %v2246_v40 = vrot.slane %v2245_v43, 1  ;;  %v2257_v16 = vmax.f32 %v2255_v48, %v2256_v0  ;;  %v2366_v5 = vsel %vm617_vm2, %v4803_v56, 0.0  ;;  %v2298_v19 = vmul.f32 1.442695, %v2272_v58 }
 0xa22   :  { %v2237_v21 = vrot.slane %v2236_v14, 2  ;;  %v2249_v11 = vrot.slane %v2248_v37, 4  ;;  %v2344_v24 = vadd.f32 %v2343_v60, %v2342_v1  ;;  %v2356_v13 = vadd.f32 %v2355_v63, %v2354_v30 }
 0xa23   :  { %v2367_v2 = vrot.slane %v2366_v5, 4  ;;  %v2247_v28 = vmax.f32 %v2245_v43, %v2246_v40  ;;  %3876 = vpow2.f32 %v2298_v19  ;;  %v2258_v25 = vrot.slane %v2257_v16, 2 }
 0xa24   :  { %v2238_v31 = vmax.f32 %v2236_v14, %v2237_v21  ;;  %v2250_v6 = vmax.f32 %v2248_v37, %v2249_v11  ;;  %v4807_v32 = vpop.eup %3872  ;;  %v2376_v8 = vrot.slane %v2375_v15, 2  ;;  %3878 = vrcp.f32 %v2316_v39 }
 0xa25   :  { %v2368_v38 = vadd.f32 %v2367_v2, %v2366_v5  ;;  %v2275_v45 = vsub.f32 %v4743_v50, %v2247_v28  ;;  %v3875_v47 = vpop.eup %3874  ;;  %v2387_v54 = vsel %vm617_vm2, %v4807_v32, 0.0  ;;  %v2259_v1 = vmax.f32 %v2257_v16, %v2258_v25 }
 0xa26   :  { %v2239_v53 = vrot.slane %v2238_v31, 1  ;;  %v2251_v30 = vrot.slane %v2250_v6, 2  ;;  %v2357_v55 = vrot.slane %v2356_v13, 1  ;;  %v2388_v41 = vrot.slane %v2387_v54, 4 }
 0xa27   :  { %v2369_v46 = vrot.slane %v2368_v38, 2  ;;  %v2304_v51 = vmul.f32 1.442695, %v2275_v45  ;;  %v2364_v20 = vrot.slane %v2363_v33, 1  ;;  %v2260_v17 = vrot.slane %v2259_v1, 1 }
 0xa28   :  { %v2240_v36 = vmax.f32 %v2238_v31, %v2239_v53  ;;  %v2252_v48 = vmax.f32 %v2250_v6, %v2251_v30  ;;  %v2377_v60 = vadd.f32 %v2376_v8, %v2375_v15  ;;  %v2389_v43 = vadd.f32 %v2388_v41, %v2387_v54 }
 0xa29   :  { %v2370_v63 = vadd.f32 %v2369_v46, %v2368_v38  ;;  %3880 = vpow2.f32 %v2304_v51  ;;  %v2261_v39 = vmax.f32 %v2259_v1, %v2260_v17  ;;  %v2358_v58 = vadd.f32 %v2357_v55, %v2356_v13 }
 0xa2a   :  { %v2274_v50 = vsub.f32 %v4745_v62, %v2240_v36  ;;  %v2253_v0 = vrot.slane %v2252_v48, 1  ;;  %3882 = vrcp.f32 %v2330_v57  ;;  %v2390_v37 = vrot.slane %v2389_v43, 2 }
 0xa2b   :  { %v2371_v14 = vrot.slane %v2370_v63, 1  ;;  %3884 = vrcp.f32 %v2337_v22  ;;  %v2277_v16 = vsub.f32 %v4752_v34, %v2261_v39  ;;  %v2365_v19 = vadd.f32 %v2364_v20, %v2363_v33 }
 0xa2c   :  { %v2302_v40 = vmul.f32 1.442695, %v2274_v50  ;;  %v2254_v5 = vmax.f32 %v2252_v48, %v2253_v0  ;;  %3886 = vrcp.f32 %v2344_v24  ;;  %v2378_v21 = vrot.slane %v2377_v60, 1 }
 0xa2d   :  { %3888 = vrcp.f32 %v2351_v26  ;;  %v4814_v15 = vpop.eup %3876  ;;  %v2308_v11 = vmul.f32 1.442695, %v2277_v16  ;;  %v2372_v57 = vadd.f32 %v2371_v14, %v2370_v63  ;;  %v2391_v13 = vadd.f32 %v2390_v37, %v2389_v43 }
 0xa2e   :  { %3890 = vpow2.f32 %v2302_v40  ;;  %v2276_v62 = vsub.f32 %v4759_v12, %v2254_v5  ;;  %v3879_v2 = vpop.eup %3878  ;;  %v2380_v22 = vsel %vm617_vm2, %v4814_v15, 0.0  ;;  %v2379_v24 = vadd.f32 %v2378_v21, %v2377_v60 }
 0xa2f   :  { %3892 = vrcp.f32 %v2358_v58  ;;  %v2381_v28 = vrot.slane %v2380_v22, 4  ;;  %v2423_v33 = vmul.f32 %v3879_v2, %v4754_v61  ;;  %v2425_v26 = vmul.f32 %v3875_v47, %v4748_v44 }
 0xa30   :  { %3894 = vpow2.f32 %v2308_v11  ;;  %v2306_v34 = vmul.f32 1.442695, %v2276_v62  ;;  %v2392_v25 = vrot.slane %v2391_v13, 1 }
 0xa31   :  { %3896 = vrcp.f32 %v2365_v19  ;;  %v2382_v31 = vadd.f32 %v2381_v28, %v2380_v22  ;;  %3605 = vmatprep.mubr.msk.f32.mxu1 %vm617_vm2, %v2423_v33 }
 0xa32   :  { %3898 = vpow2.f32 %v2306_v34  ;;  %3606 = vmatmul.mubr.msk.f32.vlgmr.msra.gmra.mrb[22].mxu1 %vm617_vm2, %v2425_v26  ;;  %v2393_v30 = vadd.f32 %v2392_v25, %v2391_v13 }
 0xa33   :  { %v4822_v12 = vpop.eup %3880  ;;  %3900 = vrcp.f32 %v2372_v57  ;;  %v2383_v8 = vrot.slane %v2382_v31, 2 }
 0xa34   :  { %v3883_v6 = vpop.eup %3882  ;;  %v2401_v38 = vsel %vm617_vm2, %v4822_v12, 0.0  ;;  %3902 = vrcp.f32 %v2379_v24 }
 0xa35   :  { %v3885_v61 = vpop.eup %3884  ;;  %v2402_v45 = vrot.slane %v2401_v38, 4  ;;  %v2427_v44 = vmul.f32 %v3883_v6, %v4765_v42  ;;  %v2384_v54 = vadd.f32 %v2383_v8, %v2382_v31  ;;  %3904 = vrcp.f32 %v2393_v30  ;;  %v3296_v30 = vld [vmem:[%s4997_s5 + $0x30] sm:$0xff] }
 0xa36   :  { %v3887_v47 = vpop.eup %3886  ;;  %v2429_v53 = vmul.f32 %v3885_v61, %v4763_v27 }
 0xa37   :  { %v3889_v1 = vpop.eup %3888  ;;  %v2403_v55 = vadd.f32 %v2402_v45, %v2401_v38  ;;  %3608 = vmatprep.mubr.msk.f32.mxu1 %vm617_vm2, %v2427_v44  ;;  %v2431_v46 = vmul.f32 %v3887_v47, %v4777_v59  ;;  %v2385_v51 = vrot.slane %v2384_v54, 1 }
 0xa38   :  { %v3891_v41 = vpop.eup %3890  ;;  %3609 = vmatmul.mubr.msk.f32.gmra.mrb[24].mxu1 %vm617_vm2, %v2429_v53  ;;  %v2433_v60 = vmul.f32 %v3889_v1, %v4774_v52 }
 0xa39   :  { %v3893_v20 = vpop.eup %3892  ;;  %v2404_v36 = vrot.slane %v2403_v55, 2  ;;  %v2394_v42 = vsel %vm617_vm2, %v3891_v41, 0.0  ;;  %3611 = vmatprep.mubr.msk.f32.mxu1 %vm617_vm2, %v2431_v46  ;;  %v2386_v48 = vadd.f32 %v2385_v51, %v2384_v54 }
 0xa3a   :  { %v3895_v17 = vpop.eup %3894  ;;  %v2395_v27 = vrot.slane %v2394_v42, 4  ;;  %v2435_v63 = vmul.f32 %v3893_v20, %v4787_v35 }
 0xa3b   :  { %v3897_v43 = vpop.eup %3896  ;;  %v2405_v50 = vadd.f32 %v2404_v36, %v2403_v55  ;;  %v2415_v59 = vsel %vm617_vm2, %v3895_v17, 0.0  ;;  %3906 = vrcp.f32 %v2386_v48  ;;  %v3297_v55 = vld [vmem:[%s4997_s5 + $0x38] sm:$0xff] }
 0xa3c   :  { %v3899_v39 = vpop.eup %3898  ;;  %v2396_v0 = vadd.f32 %v2395_v27, %v2394_v42  ;;  %v2416_v58 = vrot.slane %v2415_v59, 4  ;;  %3612 = vmatmul.mubr.msk.f32.gmra.mrb[26].mxu1 %vm617_vm2, %v2433_v60  ;;  %v2437_v52 = vmul.f32 %v3897_v43, %v4783_v4  ;;  %v3738_v46 = vpack.c.bf16 %v3297_v55, %v3296_v30 }
 0xa3d   :  { %v3901_v14 = vpop.eup %3900  ;;  %v2406_v37 = vrot.slane %v2405_v50, 1  ;;  %v2408_v40 = vsel %vm617_vm2, %v3899_v39, 0.0  ;;  %3614 = vmatprep.mubr.msk.f32.mxu1 %vm617_vm2, %v2435_v63 }
 0xa3e   :  { %v2397_v35 = vrot.slane %v2396_v0, 2  ;;  %v2417_v16 = vadd.f32 %v2416_v58, %v2415_v59  ;;  %v2409_v5 = vrot.slane %v2408_v40, 4  ;;  %v2439_v19 = vmul.f32 %v3901_v14, %v4803_v56  ;;  %v3903_v21 = vpop.eup %3902 }
 0xa3f   :  { %v2407_v57 = vadd.f32 %v2406_v37, %v2405_v50  ;;  %v2441_v34 = vmul.f32 %v3903_v21, %v4792_v7  ;;  %v3905_v56 = vpop.eup %3904 }
 0xa40   :  { %v2398_v11 = vadd.f32 %v2397_v35, %v2396_v0  ;;  %v2418_v62 = vrot.slane %v2417_v16, 2  ;;  %v2410_v2 = vadd.f32 %v2409_v5, %v2408_v40  ;;  %3615 = vmatmul.mubr.msk.f32.gmra.mrb[28].mxu1 %vm617_vm2, %v2437_v52  ;;  %v2445_v38 = vmul.f32 %v3905_v56, %v4807_v32  ;;  %v3294_v32 = vld [vmem:[%s4997_s5 + $0x20] sm:$0xff] }
 0xa41   :  { %3617 = vmatprep.mubr.msk.f32.mxu1 %vm617_vm2, %v2439_v19  ;;  %3908 = vrcp.f32 %v2407_v57 }
 0xa42   :  { %v2399_v13 = vrot.slane %v2398_v11, 1  ;;  %v2419_v22 = vadd.f32 %v2418_v62, %v2417_v16  ;;  %v2411_v28 = vrot.slane %v2410_v2, 2 }
 0xa44   :  { %v2400_v4 = vadd.f32 %v2399_v13, %v2398_v11  ;;  %v2420_v33 = vrot.slane %v2419_v22, 1  ;;  %v2412_v24 = vadd.f32 %v2411_v28, %v2410_v2  ;;  %3618 = vmatmul.mubr.msk.f32.gmra.mrb[30].mxu1 %vm617_vm2, %v2441_v34 }
 0xa45   :  { %v3907_v26 = vpop.eup %3906 }
 0xa46   :  { %v2421_v31 = vadd.f32 %v2420_v33, %v2419_v22  ;;  %v2413_v25 = vrot.slane %v2412_v24, 1  ;;  %3910 = vrcp.f32 %v2400_v4  ;;  %v2443_v6 = vmul.f32 %v3907_v26, %v4814_v15 }
 0xa48   :  { %v2414_v8 = vadd.f32 %v2413_v25, %v2412_v24  ;;  %3620 = vmatprep.mubr.msk.f32.mxu1 %vm617_vm2, %v2443_v6  ;;  %3912 = vrcp.f32 %v2421_v31 }
 0xa49   :  { %3621 = vmatmul.mubr.msk.f32.gmra.mrb[32].mxu1 %vm617_vm2, %v2445_v38 }
 0xa4a   :  { %3914 = vrcp.f32 %v2414_v8 }
 0xa4b   :  { %v3909_v7 = vpop.eup %3908 }
 0xa4c   :  { %v2449_v44 = vmul.f32 %v3909_v7, %v4822_v12  ;;  %v3295_v12 = vld [vmem:[%s4997_s5 + $0x28] sm:$0xff] }
 0xa4d   :  { %v3734_v1 = vpack.c.bf16 %v3295_v12, %v3294_v32 }
 0xa4f   :  { %3735 = vmatprep.subr.bf16.mxu0 %v3734_v1 }
 0xa50   :  { %v3911_v61 = vpop.eup %3910  ;;  %3737 = vmatpush3.bf16.msra.mxu0 %v3734_v1 }
 0xa51   :  { %v2447_v45 = vmul.f32 %v3911_v61, %v3891_v41  ;;  %3739 = vmatprep.subr.bf16.mxu0 %v3738_v46  ;;  %v2648_v41 = vpop.permute.xlu1 %2647 }
 0xa52   :  { %v3913_v47 = vpop.eup %3912 }
 0xa53   :  { %3623 = vmatprep.mubr.msk.f32.mxu1 %vm617_vm2, %v2447_v45  ;;  %v2453_v53 = vmul.f32 %v3913_v47, %v3895_v17 }
 0xa54   :  { %v3915_v54 = vpop.eup %3914  ;;  %3624 = vmatmul.mubr.msk.f32.gmra.mrb[34].mxu1 %vm617_vm2, %v2449_v44  ;;  %3741 = vmatpush3.bf16.msra.mxu0 %v3738_v46 }
 0xa55   :  { %v2451_v15 = vmul.f32 %v3915_v54, %v3899_v39  ;;  %v4874_v54 = vpop.permute.xlu1 %2649 }
 0xa57   :  { %3626 = vmatprep.mubr.msk.f32.mxu1 %vm617_vm2, %v2451_v15 }
 0xa58   :  { %3627 = vmatmul.mubr.msk.f32.gmra.mrb[36].mxu1 %vm617_vm2, %v2453_v53 }
 0xb05   :  { %v3607_v51 = vpop.f32.mrb[22].mxu1 }
 0xb06   :  { %v2654_v20 = vmul.f32 %v3607_v51, %v2648_v41  ;;  %v2568_v36 = vpop.f32.mrb[23].mxu1 }
 0xb07   :  { %v2653_v42 = vmul.f32 %v2648_v41, %v2568_v36 }
 0xb08   :  { %v2676_v17 = vsel %vm140_vm0, %v2654_v20, 0.0 }
 0xb09   :  { %v2677_v48 = vrot.slane %v2676_v17, 4  ;;  %v2669_v27 = vsel %vm140_vm0, %v2653_v42, 0.0 }
 0xb0a   :  { %v2670_v60 = vrot.slane %v2669_v27, 4 }
 0xb0b   :  { %v3610_v63 = vpop.f32.mrb[24].mxu1  ;;  %v2678_v43 = vadd.f32 %v2677_v48, %v2676_v17 }
 0xb0c   :  { %v2656_v50 = vmul.f32 %v3610_v63, %v2648_v41  ;;  %v2578_v59 = vpop.f32.mrb[25].mxu1  ;;  %v2671_v39 = vadd.f32 %v2670_v60, %v2669_v27 }
 0xb0d   :  { %v2655_v0 = vmul.f32 %v2648_v41, %v2578_v59  ;;  %v2679_v58 = vrot.slane %v2678_v43, 2 }
 0xb0e   :  { %v2690_v14 = vsel %vm140_vm0, %v2656_v50, 0.0  ;;  %v2672_v37 = vrot.slane %v2671_v39, 2 }
 0xb0f   :  { %v2691_v40 = vrot.slane %v2690_v14, 4  ;;  %v2683_v52 = vsel %vm140_vm0, %v2655_v0, 0.0  ;;  %v3613_v35 = vpop.f32.mrb[26].mxu1  ;;  %v2680_v16 = vadd.f32 %v2679_v58, %v2678_v43 }
 0xb10   :  { %v2684_v5 = vrot.slane %v2683_v52, 4  ;;  %v2658_v19 = vmul.f32 %v3613_v35, %v2648_v41  ;;  %v2588_v21 = vpop.f32.mrb[27].mxu1  ;;  %v2673_v11 = vadd.f32 %v2672_v37, %v2671_v39 }
 0xb11   :  { %v2692_v62 = vadd.f32 %v2691_v40, %v2690_v14  ;;  %v2657_v2 = vmul.f32 %v2648_v41, %v2588_v21  ;;  %v2681_v57 = vrot.slane %v2680_v16, 1 }
 0xb12   :  { %v2685_v13 = vadd.f32 %v2684_v5, %v2683_v52  ;;  %v2704_v22 = vsel %vm140_vm0, %v2658_v19, 0.0  ;;  %v2674_v28 = vrot.slane %v2673_v11, 1 }
 0xb13   :  { %v2693_v34 = vrot.slane %v2692_v62, 2  ;;  %v2705_v4 = vrot.slane %v2704_v22, 4  ;;  %v2697_v33 = vsel %vm140_vm0, %v2657_v2, 0.0  ;;  %v3616_v24 = vpop.f32.mrb[28].mxu1  ;;  %v2682_v56 = vadd.f32 %v2681_v57, %v2680_v16 }
 0xb14   :  { %v2686_v26 = vrot.slane %v2685_v13, 2  ;;  %v2698_v31 = vrot.slane %v2697_v33, 4  ;;  %v2660_v25 = vmul.f32 %v3616_v24, %v2648_v41  ;;  %v2598_v6 = vpop.f32.mrb[29].mxu1  ;;  %v2675_v8 = vadd.f32 %v2674_v28, %v2673_v11 }
 0xb15   :  { %v2694_v38 = vadd.f32 %v2693_v34, %v2692_v62  ;;  %v2706_v7 = vadd.f32 %v2705_v4, %v2704_v22  ;;  %v2659_v61 = vmul.f32 %v2648_v41, %v2598_v6 }
 0xb16   :  { %v2687_v45 = vadd.f32 %v2686_v26, %v2685_v13  ;;  %v2699_v44 = vadd.f32 %v2698_v31, %v2697_v33  ;;  %v2718_v47 = vsel %vm140_vm0, %v2660_v25, 0.0  ;;  %v2810_v15 = vsel %vm1280_vm3, %v2682_v56, %v2675_v8 }
 0xb17   :  { %v2695_v53 = vrot.slane %v2694_v38, 1  ;;  %v2707_v32 = vrot.slane %v2706_v7, 2  ;;  %v2719_v12 = vrot.slane %v2718_v47, 4  ;;  %v3619_v1 = vpop.f32.mrb[30].mxu1  ;;  %v2711_v46 = vsel %vm140_vm0, %v2659_v61, 0.0 }
 0xb18   :  { %v2688_v30 = vrot.slane %v2687_v45, 1  ;;  %v2700_v55 = vrot.slane %v2699_v44, 2  ;;  %v2662_v51 = vmul.f32 %v3619_v1, %v4874_v54  ;;  %v2608_v20 = vpop.f32.mrb[31].mxu1  ;;  %v2712_v42 = vrot.slane %v2711_v46, 4 }
 0xb19   :  { %v2708_v41 = vadd.f32 %v2707_v32, %v2706_v7  ;;  %v2720_v36 = vadd.f32 %v2719_v12, %v2718_v47  ;;  %v2661_v60 = vmul.f32 %v4874_v54, %v2608_v20  ;;  %v2696_v39 = vadd.f32 %v2695_v53, %v2694_v38 }
 0xb1a   :  { %v2689_v17 = vadd.f32 %v2688_v30, %v2687_v45  ;;  %v2701_v48 = vadd.f32 %v2700_v55, %v2699_v44  ;;  %v2732_v27 = vsel %vm140_vm0, %v2662_v51, 0.0  ;;  %v2713_v50 = vadd.f32 %v2712_v42, %v2711_v46 }
 0xb1b   :  { %v2709_v63 = vrot.slane %v2708_v41, 1  ;;  %v2721_v43 = vrot.slane %v2720_v36, 2  ;;  %v2733_v59 = vrot.slane %v2732_v27, 4  ;;  %v2725_v14 = vsel %vm140_vm0, %v2661_v60, 0.0 }
 0xb1c   :  { %v2811_v0 = vsel %vm1282_vm4, %v2689_v17, %v2810_v15  ;;  %v2702_v58 = vrot.slane %v2701_v48, 1  ;;  %v2714_v40 = vrot.slane %v2713_v50, 2  ;;  %v3622_v35 = vpop.f32.mrb[32].mxu1  ;;  %v2726_v5 = vrot.slane %v2725_v14, 4 }
 0xb1d   :  { %v2722_v37 = vadd.f32 %v2721_v43, %v2720_v36  ;;  %v2734_v52 = vadd.f32 %v2733_v59, %v2732_v27  ;;  %v2664_v19 = vmul.f32 %v3622_v35, %v4874_v54  ;;  %v2618_v21 = vpop.f32.mrb[33].mxu1  ;;  %v2812_v11 = vsel %vm1284_vm5, %v2696_v39, %v2811_v0 }
 0xb1e   :  { %v2703_v16 = vadd.f32 %v2702_v58, %v2701_v48  ;;  %v2710_v62 = vadd.f32 %v2709_v63, %v2708_v41  ;;  %v2715_v2 = vadd.f32 %v2714_v40, %v2713_v50  ;;  %v2663_v13 = vmul.f32 %v4874_v54, %v2618_v21 }
 0xb1f   :  { %v2735_v57 = vrot.slane %v2734_v52, 2  ;;  %v2723_v22 = vrot.slane %v2722_v37, 1  ;;  %v2727_v28 = vadd.f32 %v2726_v5, %v2725_v14  ;;  %v2746_v34 = vsel %vm140_vm0, %v2664_v19, 0.0 }
 0xb20   :  { %v2813_v4 = vsel %vm1286_vm6, %v2703_v16, %v2812_v11  ;;  %v2716_v33 = vrot.slane %v2715_v2, 1  ;;  %v2747_v56 = vrot.slane %v2746_v34, 4  ;;  %v2739_v31 = vsel %vm140_vm0, %v2663_v13, 0.0 }
 0xb21   :  { %v2736_v24 = vadd.f32 %v2735_v57, %v2734_v52  ;;  %v2728_v26 = vrot.slane %v2727_v28, 2  ;;  %v2814_v25 = vsel %vm1288_vm7, %v2710_v62, %v2813_v4  ;;  %v2740_v7 = vrot.slane %v2739_v31, 4 }
 0xb22   :  { %v2717_v6 = vadd.f32 %v2716_v33, %v2715_v2  ;;  %v2748_v38 = vadd.f32 %v2747_v56, %v2746_v34  ;;  %v2724_v61 = vadd.f32 %v2723_v22, %v2722_v37 }
 0xb23   :  { %v2737_v8 = vrot.slane %v2736_v24, 1  ;;  %v2729_v45 = vadd.f32 %v2728_v26, %v2727_v28  ;;  %v2741_v47 = vadd.f32 %v2740_v7, %v2739_v31 }
 0xb24   :  { %v2749_v44 = vrot.slane %v2748_v38, 2  ;;  %v2815_v15 = vsel %vm1290_vm8, %v2717_v6, %v2814_v25 }
 0xb25   :  { %v2738_v53 = vadd.f32 %v2737_v8, %v2736_v24  ;;  %v2730_v32 = vrot.slane %v2729_v45, 1  ;;  %v2816_v12 = vsel %vm1292_vm9, %v2724_v61, %v2815_v15  ;;  %v2742_v30 = vrot.slane %v2741_v47, 2 }
 0xb26   :  { %v2750_v1 = vadd.f32 %v2749_v44, %v2748_v38  ;;  %3637 = vmatprep.mubr.msk.f32.mxu0 %vm140_vm0, %v2816_v12  ;;  %v3302_v44 = vld [vmem:[%s4999_s7 + $0x20] sm:$0xff] }
 0xb27   :  { %v3625_v55 = vpop.f32.mrb[34].mxu1  ;;  %v2731_v46 = vadd.f32 %v2730_v32, %v2729_v45  ;;  %v2743_v41 = vadd.f32 %v2742_v30, %v2741_v47  ;;  %v3303_v47 = vld [vmem:[%s4999_s7 + $0x28] sm:$0xff] }
 0xb28   :  { %v2666_v51 = vmul.f32 %v3625_v55, %v4874_v54  ;;  %v2628_v20 = vpop.f32.mrb[35].mxu1  ;;  %v2751_v17 = vrot.slane %v2750_v1, 1  ;;  %v3742_v15 = vpack.c.bf16 %v3303_v47, %v3302_v44 }
 0xb29   :  { %v2665_v36 = vmul.f32 %v4874_v54, %v2628_v20  ;;  %v2817_v42 = vsel %vm1280_vm3, %v2738_v53, %v2731_v46  ;;  %v2744_v27 = vrot.slane %v2743_v41, 1  ;;  %v3298_v53 = vld [vmem:[#allocation8 + $0x1] ss:$0 sm:$0xff] }
 0xb2a   :  { %v2760_v48 = vsel %vm140_vm0, %v2666_v51, 0.0  ;;  %v2752_v37 = vadd.f32 %v2751_v17, %v2750_v1  ;;  %3743 = vmatprep.subr.bf16.mxu1 %v3742_v15 }
 0xb2b   :  { %v2761_v60 = vrot.slane %v2760_v48, 4  ;;  %v2753_v63 = vsel %vm140_vm0, %v2665_v36, 0.0  ;;  %v3628_v43 = vpop.f32.mrb[36].mxu1  ;;  %v2745_v0 = vadd.f32 %v2744_v27, %v2743_v41  ;;  %3745 = vmatpush3.bf16.msra.mxu1 %v3742_v15  ;;  %v3309_v27 = vld [vmem:[%s5001_s9 + $0x40] sm:$0xff] }
 0xb2c   :  { %v2754_v50 = vrot.slane %v2753_v63, 4  ;;  %v2668_v59 = vmul.f32 %v3628_v43, %v4874_v54  ;;  %v2638_v39 = vpop.f32.mrb[37].mxu1 }
 0xb2d   :  { %v2762_v58 = vadd.f32 %v2761_v60, %v2760_v48  ;;  %v2667_v14 = vmul.f32 %v4874_v54, %v2638_v39  ;;  %v2818_v35 = vsel %vm1282_vm4, %v2745_v0, %v2817_v42  ;;  %v3310_v60 = vld [vmem:[%s5001_s9 + $0x48] sm:$0xff]  ;;  %v3313_v39 = vld [vmem:[%s5001_s9 + $0x60] sm:$0xff] }
 0xb2e   :  { %v2755_v40 = vadd.f32 %v2754_v50, %v2753_v63  ;;  %v2774_v52 = vsel %vm140_vm0, %v2668_v59, 0.0  ;;  %v2819_v11 = vsel %vm1284_vm5, %v2752_v37, %v2818_v35  ;;  %v3311_v63 = vld [vmem:[%s5001_s9 + $0x50] sm:$0xff]  ;;  %v3750_v43 = vpack.c.bf16 %v3310_v60, %v3309_v27  ;;  %v3312_v50 = vld [vmem:[%s5001_s9 + $0x58] sm:$0xff]  ;;  %v3314_v0 = vld [vmem:[%s5001_s9 + $0x68] sm:$0xff] }
 0xb2f   :  { %v2763_v16 = vrot.slane %v2762_v58, 2  ;;  %v2775_v5 = vrot.slane %v2774_v52, 4  ;;  %v2767_v19 = vsel %vm140_vm0, %v2667_v14, 0.0  ;;  %v3754_v59 = vpack.c.bf16 %v3312_v50, %v3311_v63 }
 0xb30   :  { %v2756_v21 = vrot.slane %v2755_v40, 2  ;;  %v2768_v62 = vrot.slane %v2767_v19, 4  ;;  %3751 = vmatprep.subr.bf16.mxu0 %v3750_v43 }
 0xb31   :  { %v2764_v2 = vadd.f32 %v2763_v16, %v2762_v58  ;;  %v2776_v57 = vadd.f32 %v2775_v5, %v2774_v52  ;;  %v3758_v58 = vpack.c.bf16 %v3314_v0, %v3313_v39 }
 0xb32   :  { %v2757_v13 = vadd.f32 %v2756_v21, %v2755_v40  ;;  %v2769_v22 = vadd.f32 %v2768_v62, %v2767_v19 }
 0xb33   :  { %v2765_v28 = vrot.slane %v2764_v2, 1  ;;  %v2777_v54 = vrot.slane %v2776_v57, 2 }
 0xb34   :  { %v2758_v34 = vrot.slane %v2757_v13, 1  ;;  %v2770_v4 = vrot.slane %v2769_v22, 2 }
 0xb35   :  { %v2778_v33 = vadd.f32 %v2777_v54, %v2776_v57  ;;  %v2766_v26 = vadd.f32 %v2765_v28, %v2764_v2 }
 0xb36   :  { %v2759_v24 = vadd.f32 %v2758_v34, %v2757_v13  ;;  %v2771_v56 = vadd.f32 %v2770_v4, %v2769_v22  ;;  %v4948_v22 = vld [vmem:[%s5003_s11 + $0x4] sm:$0xf] }
 0xb37   :  { %v2779_v31 = vrot.slane %v2778_v33, 1  ;;  %v2940_v54 = vrot.slane %v4948_v22, %v4303_v29  ;;  %v3315_v29 = vld [vmem:[%s5001_s9 + $0x70] sm:$0xff] }
 0xb38   :  { %v2820_v25 = vsel %vm1286_vm6, %v2759_v24, %v2819_v11  ;;  %v2772_v6 = vrot.slane %v2771_v56, 1 }
 0xb39   :  { %v2821_v8 = vsel %vm1288_vm7, %v2766_v26, %v2820_v25  ;;  %v2780_v7 = vadd.f32 %v2779_v31, %v2778_v33  ;;  %v2946_v33 = vrot.slane %v4948_v22, %v1422_v9 }
 0xb3a   :  { %v2773_v38 = vadd.f32 %v2772_v6, %v2771_v56 }
 0xb3c   :  { %v2822_v61 = vsel %vm1290_vm8, %v2773_v38, %v2821_v8  ;;  %v3316_v38 = vld [vmem:[%s5001_s9 + $0x78] sm:$0xff]  ;;  %s4104_s9 = smov [#allocation13]  }
 0xb3d   :  { %v2823_v45 = vsel %vm1292_vm9, %v2780_v7, %v2822_v61  ;;  %v3762_v9 = vpack.c.bf16 %v3316_v38, %v3315_v29  ;;  %v3306_v7 = vld [vmem:[#allocation10 + $0x1] ss:$0 sm:$0xff]  ;;  %s3194_s28 = sshll.u32 %s4104_s9, 4  ;;  %s3195_s28 = int_to_ptr.vmem [resolvable:$true] %s3194_s28 }
 0xb3e   :  { %3638 = vmatmul.mubr.msk.f32.vlgmr.msra.gmra.mrb[36].mxu0 %vm140_vm0, %v2823_v45  ;;  %s4059_s5 = scalar_lea.vmem %s3195_s28, 256  ;;  %p4064_p7 = scmp.lt.s32.totalorder %s3195_s28, %s3195_s28 }
 0xb3f   :  { %3753 = vmatpush3.bf16.msra.mxu0 %v3750_v43  ;;  %p4060_p6 = scmp.ne.s32.totalorder %s3195_s28, %s4059_s5  ;;  %p4065_p8 = scmp.lt.s32.totalorder %s4059_s5, %s4059_s5 }
 0xb40   :  { %3755 = vmatprep.subr.bf16.mxu0 %v3754_v59 }
 0xb41   :  { %p4066_p9 = por %p4065_p8, %p4064_p7 }
 0xb43   :  { %3757 = vmatpush3.bf16.msra.mxu0 %v3754_v59  ;;  %p4067_p10 = pnand %p4066_p9, %p4060_p6 }
 0xb44   :  { %3759 = vmatprep.subr.bf16.mxu0 %v3758_v58 }
 0xb47   :  { %3761 = vmatpush3.bf16.msra.mxu0 %v3758_v58 }
 0xb48   :  { %3763 = vmatprep.subr.bf16.mxu0 %v3762_v9 }
 0xb4b   :  { %3765 = vmatpush3.bf16.msra.mxu0 %v3762_v9 }
 0xc11   :  { %v3639_v32 = vpop.f32.mrb[36].mxu0 }
 0xc12   :  { %v2900_v12 = vadd.f32 %v3639_v32, %v3298_v53  ;;  %v2894_v1 = vpop.f32.mrb[37].mxu0  ;;  %v3317_v32 = vld [vmem:[#allocation11 + $0x1] ss:$0 sm:$0xff] }
 0xc13   :  { %v2895_v30 = vadd.f32 %v3298_v53, %v2894_v1 }
 0xc14   :  { %v2906_v55 = vadd.f32 %v2900_v12, %v4650_v49  ;;  %v3304_v49 = vld [vmem:[%s4999_s7 + $0x30] sm:$0xff] }
 0xc15   :  { %v2905_v46 = vadd.f32 %v2895_v30, %v4648_v18  ;;  %v3305_v18 = vld [vmem:[%s4999_s7 + $0x38] sm:$0xff] }
 0xc16   :  { %v2910_v51 = vsel %vm140_vm0, %v2906_v55, 0.0  ;;  %v2916_v42 = vmul.f32 %v2906_v55, %v2906_v55  ;;  %v3746_v48 = vpack.c.bf16 %v3305_v18, %v3304_v49 }
 0xc17   :  { %2911 = vadd.xlane.f32.xlu1 %v2910_v51  ;;  %v2907_v20 = vsel %vm140_vm0, %v2905_v46, 0.0  ;;  %v2915_v41 = vmul.f32 %v2905_v46, %v2905_v46 }
 0xc18   :  { %2908 = vadd.xlane.f32.xlu0 %v2907_v20  ;;  %v2920_v17 = vsel %vm140_vm0, %v2916_v42, 0.0  ;;  %3747 = vmatprep.subr.bf16.mxu1 %v3746_v48 }
 0xc19   :  { %v2917_v36 = vsel %vm140_vm0, %v2915_v41, 0.0  ;;  %3749 = vmatpush3.bf16.msra.mxu1 %v3746_v48 }
 0xc1c   :  { %2918 = vadd.xlane.f32.xlu0 %v2917_v36 }
 0xc20   :  { %2921 = vadd.xlane.f32.xlu0 %v2920_v17 }
 0xca4   :  { %v2912_v40 = vpop.xlane.xlu1 %2911 }
 0xca5   :  { %v2909_v14 = vpop.xlane.xlu0 %2908  ;;  %v2914_v35 = vmul.f32 0.03125, %v2912_v40 }
 0xca6   :  { %v2913_v37 = vmul.f32 0.03125, %v2909_v14 }
 0xca7   :  { %v2926_v11 = vmul.f32 %v2914_v35, %v2914_v35  ;;  %v2930_v24 = vsub.f32 %v2906_v55, %v2914_v35  ;;  %v3178_v35 = vrot.slane %v4948_v22, %v1651_v3 }
 0xca8   :  { %v2925_v16 = vmul.f32 %v2913_v37, %v2913_v37  ;;  %v2929_v28 = vsub.f32 %v2905_v46, %v2913_v37 }
 0xca9   :  { %v2919_v52 = vpop.xlane.xlu0 %2918 }
 0xcaa   :  { %v2923_v5 = vmul.f32 0.03125, %v2919_v52 }
 0xcac   :  { %v2927_v19 = vsub.f32 %v2923_v5, %v2925_v16 }
 0xcad   :  { %v2922_v21 = vpop.xlane.xlu0 %2921 }
 0xcae   :  { %v2931_v62 = vadd.f32 1e-05, %v2927_v19  ;;  %v2924_v2 = vmul.f32 0.03125, %v2922_v21 }
 0xcb0   :  { %3916 = vrsqrt.f32 %v2931_v62  ;;  %v2928_v57 = vsub.f32 %v2924_v2, %v2926_v11  ;;  %v3184_v11 = vrot.slane %v4948_v22, %v1657_v10 }
 0xcb2   :  { %v2932_v13 = vadd.f32 1e-05, %v2928_v57 }
 0xcb4   :  { %3918 = vrsqrt.f32 %v2932_v13 }
 0xcba   :  { %v3917_v34 = vpop.eup %3916 }
 0xcbb   :  { %v2935_v4 = vmul.f32 %v3917_v34, %v2929_v28 }
 0xcbd   :  { %v2941_v56 = vmul.f32 %v2940_v54, %v2935_v4 }
 0xcbe   :  { %v3919_v26 = vpop.eup %3918 }
 0xcbf   :  { %v2936_v31 = vmul.f32 %v3919_v26, %v2930_v24  ;;  %v2947_v25 = vadd.f32 %v2946_v33, %v2941_v56 }
 0xcc1   :  { %v2942_v6 = vmul.f32 %v2940_v54, %v2936_v31  ;;  %3648 = vmatprep.mubr.msk.f32.mxu1 %vm140_vm0, %v2947_v25 }
 0xcc3   :  { %v2948_v8 = vadd.f32 %v2946_v33, %v2942_v6 }
 0xcc5   :  { %3649 = vmatmul.mubr.msk.f32.vlgmr.msra.gmra.mrb[38].mxu1 %vm140_vm0, %v2948_v8 }
 0xd98   :  { %v3650_v61 = vpop.f32.mrb[38].mxu1 }
 0xd99   :  { %v3040_v45 = vadd.f32 %v3650_v61, %v3306_v7  ;;  %v3034_v44 = vpop.f32.mrb[39].mxu1 }
 0xd9a   :  { %v3035_v47 = vadd.f32 %v3306_v7, %v3034_v44 }
 0xd9b   :  { %v3044_v53 = vmax.f32 %v3040_v45, 0.0 }
 0xd9c   :  { %v3043_v15 = vmax.f32 %v3035_v47, 0.0 }
 0xd9e   :  { %3667 = vmatprep.mubr.msk.f32.mxu0 %vm1535_vm10, %v3043_v15 }
 0xd9f   :  { %3668 = vmatmul.mubr.msk.f32.vlgmr.msra.gmra.mrb[38].mxu0 %vm1535_vm10, %v3044_v53 }
 0xe72   :  { %v3669_v12 = vpop.f32.mrb[38].mxu0 }
 0xe73   :  { %v3140_v1 = vadd.f32 %v3669_v12, %v3317_v32  ;;  %v3134_v30 = vpop.f32.mrb[39].mxu0 }
 0xe74   :  { %v3135_v55 = vadd.f32 %v3317_v32, %v3134_v30 }
 0xe75   :  { %v3144_v46 = vadd.f32 %v3140_v1, %v2948_v8 }
 0xe76   :  { %v3143_v51 = vadd.f32 %v3135_v55, %v2947_v25 }
 0xe77   :  { %v3148_v20 = vsel %vm140_vm0, %v3144_v46, 0.0  ;;  %v3154_v41 = vmul.f32 %v3144_v46, %v3144_v46 }
 0xe78   :  { %3149 = vadd.xlane.f32.xlu0 %v3148_v20  ;;  %v3145_v36 = vsel %vm140_vm0, %v3143_v51, 0.0  ;;  %v3153_v42 = vmul.f32 %v3143_v51, %v3143_v51 }
 0xe79   :  { %3146 = vadd.xlane.f32.xlu1 %v3145_v36  ;;  %v3158_v17 = vsel %vm140_vm0, %v3154_v41, 0.0 }
 0xe7a   :  { %v3155_v49 = vsel %vm140_vm0, %v3153_v42, 0.0 }
 0xe7c   :  { %3159 = vadd.xlane.f32.xlu0 %v3158_v17 }
 0xe7d   :  { %3156 = vadd.xlane.f32.xlu1 %v3155_v49 }
 0xf05   :  { %v3150_v18 = vpop.xlane.xlu0 %3149 }
 0xf06   :  { %v3152_v48 = vmul.f32 0.03125, %v3150_v18  ;;  %v3147_v27 = vpop.xlane.xlu1 %3146 }
 0xf07   :  { %v3151_v60 = vmul.f32 0.03125, %v3147_v27 }
 0xf08   :  { %v3164_v43 = vmul.f32 %v3152_v48, %v3152_v48  ;;  %v3168_v52 = vsub.f32 %v3144_v46, %v3152_v48 }
 0xf09   :  { %v3160_v63 = vpop.xlane.xlu0 %3159  ;;  %v3163_v39 = vmul.f32 %v3151_v60, %v3151_v60  ;;  %v3167_v5 = vsub.f32 %v3143_v51, %v3151_v60 }
 0xf0a   :  { %v3162_v50 = vmul.f32 0.03125, %v3160_v63  ;;  %v3157_v59 = vpop.xlane.xlu1 %3156 }
 0xf0b   :  { %v3161_v0 = vmul.f32 0.03125, %v3157_v59 }
 0xf0c   :  { %v3166_v58 = vsub.f32 %v3162_v50, %v3164_v43 }
 0xf0d   :  { %v3165_v14 = vsub.f32 %v3161_v0, %v3163_v39 }
 0xf0e   :  { %v3170_v37 = vadd.f32 1e-05, %v3166_v58 }
 0xf0f   :  { %v3169_v40 = vadd.f32 1e-05, %v3165_v14 }
 0xf10   :  { %3920 = vrsqrt.f32 %v3170_v37 }
 0xf11   :  { %3922 = vrsqrt.f32 %v3169_v40 }
 0xf1a   :  { %v3921_v16 = vpop.eup %3920 }
 0xf1b   :  { %v3923_v19 = vpop.eup %3922  ;;  %v3174_v21 = vmul.f32 %v3921_v16, %v3168_v52 }
 0xf1c   :  { %v3173_v62 = vmul.f32 %v3923_v19, %v3167_v5 }
 0xf1d   :  { %v3180_v2 = vmul.f32 %v3178_v35, %v3174_v21 }
 0xf1e   :  { %v3179_v57 = vmul.f32 %v3178_v35, %v3173_v62 }
 0xf1f   :  { %v3186_v13 = vadd.f32 %v3184_v11, %v3180_v2 }
 0xf20   :  { %v3185_v28 = vadd.f32 %v3184_v11, %v3179_v57 }
 0xf21   :  { %3188 = vst.msk [vmem:[#allocation13 + $0x8] sm:$0xff] %vm140_vm0, %v3186_v13 }
 0xf22   :  { %3187 = vst.msk [vmem:[#allocation13] sm:$0xff] %vm140_vm0, %v3185_v28 }
 0xf23   :  { %4070 = shalt.err (!%p4067_p10)
}
 0xf24   :  { %s4071_s29 = scalar_lea.hbm %s5004_s12, 256 }
 0xf25   :  { %p4072_p11 = scmp.ne.s32.totalorder %s5004_s12, %s4071_s29  ;;  %p4075_p12 = scmp.lt.u32.totalorder %s4071_s29, %s5004_s12 }
 0xf27   :  { %p4077_p13 = pnand %p4075_p12, %p4072_p11 }
 0xf29   :  { %4080 = shalt.err (!%p4077_p13)
}
 0xf2a   :  { %3200 = dma.vmem_to_hbm [thread:$0]  %s3195_s28, 256, %s5004_s12, [#allocation4], %s4096_s6, %s4096_s6, %s4097_s16  }
 0xf2b   :  { %4089 = dma.done.wait [#allocation4], 256  }
 0xf2c   :  { %4090 = vsyncadd [#allocation4], 4294967040 }
 0xf2d   :  { %3204 = vsyncpa [#allocation3], 1 }
 0xf2e   :  { %3205 = vsyncpa [#allocation6], 1 }
 0xf2f   :  { %3206 = vsyncpa [#allocation9], 1 }
 0xf30   :  { %3207 = vsyncpa [#allocation12], 1 }
 0xf31   :  { %3208 = vsyncpa [#allocation4], 1 }

</bundles_post_ra>
